<compile_context>
chip_gen: v7x
topology: tpu7x:2x2x1
jax: 0.10.0
libtpu: 0.0.40
codegen_flags: <defaults>
</compile_context>

<pallas_src>
import functools

import jax
import jax.numpy as jnp
from jax.experimental import pallas as pl
from jax.experimental.pallas import tpu as pltpu

EPS = 1e-5  # InstanceNorm2d default eps


def _half_block(in_ref, masks_ref, w_ref, b_ref, dw_ref, db_ref, out_ref, *,
                W, use_mxu):
    """1x1 conv -> depthwise 3x3 (pad=1) -> InstanceNorm -> ReLU.

    in_ref   : (NB, Ci, HW)       out_ref : (NB, Co, HW)   (HW = H*W on the lane axis)
    masks_ref: (8, HW) f32 border-validity masks for the 8 non-center taps
    w_ref    : (Co, Ci) [MXU path] or (Ci, Co, 1) [VPU FMA path]
    b_ref    : (Co, 1)
    dw_ref   : (9, Co, 1)          db_ref  : (Co, 1)
    Dropout(0.65) is identity in eval mode.
    """
    NB, Ci, HW = in_ref.shape
    Co = out_ref.shape[1]

    # ---- 1x1 conv ----
    if use_mxu:
        # Realistic channel widths: batched (Co,Ci)@(Ci,HW) on the MXU, f32 accumulate.
        x = in_ref[...].astype(jnp.float32)                        # (NB, Ci, HW)
        wT = w_ref[...].astype(jnp.float32)                        # (Co, Ci)
        wb = jnp.broadcast_to(wT[None], (NB, Co, Ci))
        acc = jax.lax.dot_general(
            wb, x,
            dimension_numbers=(((2,), (1,)), ((0,), (0,))),
            preferred_element_type=jnp.float32)                    # (NB, Co, HW)
    else:
        # Tiny channel counts: Ci broadcast-FMA terms on the VPU (MXU would be ~idle).
        # TODO(synk): a stride-0 sublane load (in_ref[:, pl.ds(ci, Co, stride=0), :])
        # would move this broadcast onto the vld slots; plain slice kept for
        # lowering robustness.
        acc = None
        for ci in range(Ci):
            xi = in_ref[:, ci:ci + 1, :].astype(jnp.float32)       # (NB, 1, HW)
            term = xi * w_ref[ci]                                  # * (Co,1) -> (NB,Co,HW)
            acc = term if acc is None else acc + term
    acc = acc + b_ref[...]                                         # + (Co, 1)

    # Lane-dense 2-D view; layout-free because Co % 8 == 0 (padded on the host).
    y = acc.reshape(NB * Co, HW)

    # Depthwise params replicated across the batch block once (hoisted, in-kernel).
    dw = dw_ref[...]                                               # (9, Co, 1) f32
    if NB == 1:
        dw_taps = [dw[t] for t in range(9)]                        # (Co, 1)
        db_t = db_ref[...]                                         # (Co, 1)
    else:
        dw_taps = [jnp.broadcast_to(dw[t], (NB, Co, 1)).reshape(NB * Co, 1)
                   for t in range(9)]
        db_t = jnp.broadcast_to(db_ref[...], (NB, Co, 1)).reshape(NB * Co, 1)

    # ---- depthwise 3x3, padding=1: XLU rolls along flat H*W + host-made masks ----
    out = None
    m_idx = 0
    for dy in range(3):
        for dx in range(3):
            s = (dy - 1) * W + (dx - 1)                            # flat source offset
            if dy == 1 and dx == 1:
                shifted = y                                        # center tap, no mask
            else:
                shifted = pltpu.roll(y, shift=(-s) % HW, axis=1)
                shifted = shifted * masks_ref[m_idx:m_idx + 1, :]  # zero invalid borders
                m_idx += 1
            tap = shifted * dw_taps[dy * 3 + dx]
            out = tap if out is None else out + tap
    out = out + db_t

    # ---- InstanceNorm2d (per (n, c) over all H*W, biased variance) + ReLU ----
    mean = jnp.mean(out, axis=1, keepdims=True)
    cen = out - mean
    var = jnp.mean(cen * cen, axis=1, keepdims=True)
    z = jnp.maximum(cen * jax.lax.rsqrt(var + EPS), 0.0)

    # ---- Dropout(0.65): identity (inference / eval mode) ----
    # TODO(synk): training-mode dropout would need pltpu.prng_* masking + 1/(1-p) scaling.
    out_ref[...] = z.reshape(NB, Co, HW).astype(out_ref.dtype)


def convblock_kernel(x_ref, masks_ref,
                     w1_ref, b1_ref, dw1_ref, db1_ref,
                     w2_ref, b2_ref, dw2_ref, db2_ref,
                     o_ref, h_scr, *, W, mxu1, mxu2):
    _half_block(x_ref, masks_ref, w1_ref, b1_ref, dw1_ref, db1_ref, h_scr,
                W=W, use_mxu=mxu1)
    _half_block(h_scr, masks_ref, w2_ref, b2_ref, dw2_ref, db2_ref, o_ref,
                W=W, use_mxu=mxu2)


def _padded_block_bytes(shape, itemsize=4):
    """VMEM bytes of an f32 block after (8, 128) tiling of the last two dims."""
    if len(shape) == 1:
        n = shape[0] * itemsize
        p = 1
        while p < n:
            p *= 2
        return p
    s = list(shape)
    s[-1] = -(-s[-1] // 128) * 128
    s[-2] = -(-s[-2] // 8) * 8
    total = itemsize
    for d in s:
        total *= d
    return total


def conv_block_forward(x_nchw, params, *, batch_block=None):
    """x_nchw: (N, Cin, H, W). Returns (N, Cout, H, W), matching PyTorch."""
    w1, b1, dw1, db1, w2, b2, dw2, db2 = params
    N, Cin, H, W = x_nchw.shape
    Cout = w1.shape[1]
    HW = H * W

    # Pad Cout to a multiple of 8 (zero weights/biases) so the in-kernel
    # (NB, Co, HW) <-> (NB*Co, HW) merges never cross (8, 128) tile boundaries.
    Co = -(-Cout // 8) * 8
    cpad = Co - Cout

    mxu1 = Cin >= 16            # wide contraction -> MXU; tiny channels stay on the VPU
    mxu2 = Cout >= 16

    def prep(w, b, dw, db, use_mxu):
        # w: (ci, Cout)  b: (1, Cout)  dw: (3, 3, Cout)  db: (1, Cout)
        wp = jnp.pad(w.astype(jnp.float32), ((0, 0), (0, cpad)))           # (ci, Co)
        wk = wp.T if use_mxu else wp.reshape(wp.shape[0], Co, 1)
        bk = jnp.pad(b.reshape(-1).astype(jnp.float32), (0, cpad)).reshape(Co, 1)
        dwk = jnp.pad(dw.reshape(9, Cout).astype(jnp.float32),
                      ((0, 0), (0, cpad))).reshape(9, Co, 1)
        dbk = jnp.pad(db.reshape(-1).astype(jnp.float32), (0, cpad)).reshape(Co, 1)
        return wk, bk, dwk, dbk

    w1k, b1k, dw1k, db1k = prep(w1, b1, dw1, db1, mxu1)
    # Second 1x1 conv consumes the padded Co channels (extra input rows see zeros).
    w2p = jnp.pad(w2.astype(jnp.float32), ((0, cpad), (0, 0)))             # (Co, Cout)
    w2k, b2k, dw2k, db2k = prep(w2p, b2, dw2, db2, mxu2)

    # Host-precomputed border-validity masks for the 8 non-center 3x3 taps.
    pos = jnp.arange(HW, dtype=jnp.int32)
    row, col = pos // W, pos % W
    rvalid = (row >= 1, None, row <= H - 2)
    cvalid = (col >= 1, None, col <= W - 2)
    mrows = []
    for dy in range(3):
        for dx in range(3):
            if dy == 1 and dx == 1:
                continue
            v, h = rvalid[dy], cvalid[dx]
            m = v if h is None else (h if v is None else jnp.logical_and(v, h))
            mrows.append(m.astype(jnp.float32))
    masks = jnp.stack(mrows, axis=0)                                        # (8, HW)

    # NCHW -> (N, C, H*W): pure metadata reshape, no transpose / data movement.
    x = x_nchw.reshape(N, Cin, HW)

    # ---- batch blocking: amortize per-step overhead but keep the grid >= 2 steps
    # (ideally >= 4) so both v7x TensorCores get work and pipelining overlaps DMA.
    per_img_act = (_padded_block_bytes((1, Cin, HW))
                   + 2 * _padded_block_bytes((1, Co, HW)))
    if batch_block is None:
        mem_cap = max(1, (6 * 1024 * 1024) // per_img_act)
        grid_cap = max(1, N // 4)
        cap = max(1, min(mem_cap, grid_cap, N))
        batch_block = 1
        for cand in range(cap, 0, -1):
            if N % cand == 0:
                batch_block = cand
                break
    NB = batch_block
    assert N % NB == 0, (N, NB)

    param_arrays = (masks, w1k, b1k, dw1k, db1k, w2k, b2k, dw2k, db2k)

    def param_spec(shape):
        nd = len(shape)
        return pl.BlockSpec(shape, lambda n, _nd=nd: (0,) * _nd)

    # ---- VMEM budget: double-buffered in/out blocks + scratch + lane-padded,
    # double-buffered parameter blocks + slack; capped below chip VMEM capacity.
    x_blk = _padded_block_bytes((NB, Cin, HW))
    o_blk = _padded_block_bytes((NB, Co, HW))
    param_bytes = sum(_padded_block_bytes(a.shape) for a in param_arrays)
    needed = 2 * (x_blk + o_blk) + o_blk + 2 * param_bytes + (2 << 20)
    try:
        vmem_cap = pltpu.get_tpu_info().vmem_capacity_bytes
    except Exception:
        vmem_cap = 64 * 1024 * 1024     # v7x-safe assumption
    vmem_limit = int(min(max(needed, 8 * 1024 * 1024), int(vmem_cap * 0.85)))

    kernel = functools.partial(convblock_kernel, W=W, mxu1=mxu1, mxu2=mxu2)
    out = pl.pallas_call(
        kernel,
        out_shape=jax.ShapeDtypeStruct((N, Co, HW), x_nchw.dtype),
        grid_spec=pltpu.PrefetchScalarGridSpec(
            num_scalar_prefetch=0,
            grid=(N // NB,),
            in_specs=[pl.BlockSpec((NB, Cin, HW), lambda n: (n, 0, 0))]
                     + [param_spec(a.shape) for a in param_arrays],
            out_specs=pl.BlockSpec((NB, Co, HW), lambda n: (n, 0, 0)),
            scratch_shapes=[pltpu.VMEM((NB, Co, HW), jnp.float32)],
        ),
        compiler_params=pltpu.CompilerParams(
            dimension_semantics=("parallel",),
            vmem_limit_bytes=vmem_limit,
        ),
    )(x, *param_arrays)
    # TODO(synk): for realistic U-Net sizes (e.g. C=64, 256x256) whole-image blocks
    # exceed v7x's 64 MiB VMEM; add an 'arbitrary' inner grid axis over row tiles with
    # a two-pass InstanceNorm (sum/sumsq VMEM scratch) and a one-row depthwise halo.
    return out.reshape(N, Co, H, W)[:, :Cout]


# ---------------- pure-JAX reference (NCHW, mirrors PyTorch semantics) ----------------
def conv_block_ref(x, params):
    w1, b1, dw1, db1, w2, b2, dw2, db2 = params

    def half(x, w, b, dw, db):
        Cout = w.shape[1]
        wk = jnp.transpose(w)[:, :, None, None]                    # (Cout, Cin, 1, 1)
        y = jax.lax.conv_general_dilated(
            x, wk, (1, 1), 'VALID',
            dimension_numbers=('NCHW', 'OIHW', 'NCHW'),
            precision=jax.lax.Precision.HIGHEST)
        y = y + b.reshape(1, Cout, 1, 1)
        dwk = jnp.transpose(dw, (2, 0, 1))[:, None, :, :]           # (Cout, 1, 3, 3)
        y = jax.lax.conv_general_dilated(
            y, dwk, (1, 1), ((1, 1), (1, 1)),
            dimension_numbers=('NCHW', 'OIHW', 'NCHW'),
            feature_group_count=Cout,
            precision=jax.lax.Precision.HIGHEST)
        y = y + db.reshape(1, Cout, 1, 1)
        mean = jnp.mean(y, axis=(2, 3), keepdims=True)
        var = jnp.mean((y - mean) ** 2, axis=(2, 3), keepdims=True)
        z = (y - mean) / jnp.sqrt(var + EPS)
        return jnp.maximum(z, 0.0)

    h = half(x, w1, b1, dw1, db1)
    h = half(h, w2, b2, dw2, db2)
    return h


if __name__ == "__main__":
    N, Cin, Cout, H, W = 2, 4, 8, 16, 16

    key = jax.random.PRNGKey(0)
    ks = jax.random.split(key, 9)
    # Deterministic synthetic parameters (shapes implied by ConvBlock.__init__):
    #   Conv2d(Cin,Cout,1): weight (Cout,Cin,1,1) stored here as (Cin,Cout); bias (1,Cout)
    #   Conv2d(Cout,Cout,3,groups=Cout): weight (Cout,1,3,3) stored as (3,3,Cout); bias (1,Cout)
    w1  = jax.random.normal(ks[0], (Cin, Cout),  jnp.float32) * 0.5
    b1  = jax.random.normal(ks[1], (1, Cout),    jnp.float32) * 0.1
    dw1 = jax.random.normal(ks[2], (3, 3, Cout), jnp.float32) * 0.3
    db1 = jax.random.normal(ks[3], (1, Cout),    jnp.float32) * 0.1
    w2  = jax.random.normal(ks[4], (Cout, Cout), jnp.float32) * 0.5
    b2  = jax.random.normal(ks[5], (1, Cout),    jnp.float32) * 0.1
    dw2 = jax.random.normal(ks[6], (3, 3, Cout), jnp.float32) * 0.3
    db2 = jax.random.normal(ks[7], (1, Cout),    jnp.float32) * 0.1
    params = (w1, b1, dw1, db1, w2, b2, dw2, db2)

    x = jax.random.normal(ks[8], (N, Cin, H, W), jnp.float32)

    out = jax.jit(conv_block_forward)(x, params)
    out = jax.block_until_ready(out)

    ref = jax.block_until_ready(conv_block_ref(x, params))
    assert out.shape == (N, Cout, H, W), out.shape
    assert jnp.allclose(out, ref, rtol=1e-4, atol=1e-4), \
        float(jnp.max(jnp.abs(out - ref)))

    print("KERNEL_OK")
</pallas_src>

<mosaic_0001>
module attributes {stable_mosaic.version = 11 : i64} {
  func.func @convblock_kernel(%arg0: i32, %arg1: memref<1x4x256xf32, #tpu.memory_space<vmem>>, %arg2: memref<8x256xf32, #tpu.memory_space<vmem>>, %arg3: memref<4x8x1xf32, #tpu.memory_space<vmem>>, %arg4: memref<8x1xf32, #tpu.memory_space<vmem>>, %arg5: memref<9x8x1xf32, #tpu.memory_space<vmem>>, %arg6: memref<8x1xf32, #tpu.memory_space<vmem>>, %arg7: memref<8x8x1xf32, #tpu.memory_space<vmem>>, %arg8: memref<8x1xf32, #tpu.memory_space<vmem>>, %arg9: memref<9x8x1xf32, #tpu.memory_space<vmem>>, %arg10: memref<8x1xf32, #tpu.memory_space<vmem>>, %arg11: memref<1x8x256xf32, #tpu.memory_space<vmem>>, %arg12: memref<1x8x256xf32, #tpu.memory_space<vmem>>) attributes {dimension_semantics = [#tpu.dimension_semantics<parallel>], iteration_bounds = array<i64: 2>, scalar_prefetch = 0 : i64, scratch_operands = 1 : i64, tpu.core_type = #tpu.core_type<tc>, window_params = [{transform_indices = @transform_0, window_bounds = array<i64: 1, 4, 256>}, {pipeline_mode = #tpu.pipeline_mode<synchronous>, transform_indices = @transform_1, window_bounds = array<i64: 8, 256>}, {pipeline_mode = #tpu.pipeline_mode<synchronous>, transform_indices = @transform_2, window_bounds = array<i64: 4, 8, 1>}, {pipeline_mode = #tpu.pipeline_mode<synchronous>, transform_indices = @transform_3, window_bounds = array<i64: 8, 1>}, {pipeline_mode = #tpu.pipeline_mode<synchronous>, transform_indices = @transform_4, window_bounds = array<i64: 9, 8, 1>}, {pipeline_mode = #tpu.pipeline_mode<synchronous>, transform_indices = @transform_5, window_bounds = array<i64: 8, 1>}, {pipeline_mode = #tpu.pipeline_mode<synchronous>, transform_indices = @transform_6, window_bounds = array<i64: 8, 8, 1>}, {pipeline_mode = #tpu.pipeline_mode<synchronous>, transform_indices = @transform_7, window_bounds = array<i64: 8, 1>}, {pipeline_mode = #tpu.pipeline_mode<synchronous>, transform_indices = @transform_8, window_bounds = array<i64: 9, 8, 1>}, {pipeline_mode = #tpu.pipeline_mode<synchronous>, transform_indices = @transform_9, window_bounds = array<i64: 8, 1>}, {transform_indices = @transform_10, window_bounds = array<i64: 1, 8, 256>}]} {
    %c0 = arith.constant 0 : index
    %c0_0 = arith.constant 0 : index
    %c0_1 = arith.constant 0 : index
    %0 = vector.load %arg1[%c0, %c0_0, %c0_1] : memref<1x4x256xf32, #tpu.memory_space<vmem>>, vector<1x1x256xf32>
    %c0_2 = arith.constant 0 : index
    %c0_3 = arith.constant 0 : index
    %c0_4 = arith.constant 0 : index
    %1 = vector.load %arg3[%c0_2, %c0_3, %c0_4] : memref<4x8x1xf32, #tpu.memory_space<vmem>>, vector<1x8x1xf32>
    %2 = vector.shape_cast %1 : vector<1x8x1xf32> to vector<8x1xf32>
    %3 = vector.shape_cast %2 : vector<8x1xf32> to vector<1x8x1xf32>
    %4 = vector.broadcast %0 : vector<1x1x256xf32> to vector<1x8x256xf32>
    %5 = vector.broadcast %3 : vector<1x8x1xf32> to vector<1x8x256xf32>
    %6 = arith.mulf %4, %5 : vector<1x8x256xf32>
    %c0_5 = arith.constant 0 : index
    %c1 = arith.constant 1 : index
    %c0_6 = arith.constant 0 : index
    %7 = vector.load %arg1[%c0_5, %c1, %c0_6] : memref<1x4x256xf32, #tpu.memory_space<vmem>>, vector<1x1x256xf32>
    %c1_7 = arith.constant 1 : index
    %c0_8 = arith.constant 0 : index
    %c0_9 = arith.constant 0 : index
    %8 = vector.load %arg3[%c1_7, %c0_8, %c0_9] : memref<4x8x1xf32, #tpu.memory_space<vmem>>, vector<1x8x1xf32>
    %9 = vector.shape_cast %8 : vector<1x8x1xf32> to vector<8x1xf32>
    %10 = vector.shape_cast %9 : vector<8x1xf32> to vector<1x8x1xf32>
    %11 = vector.broadcast %7 : vector<1x1x256xf32> to vector<1x8x256xf32>
    %12 = vector.broadcast %10 : vector<1x8x1xf32> to vector<1x8x256xf32>
    %13 = arith.mulf %11, %12 : vector<1x8x256xf32>
    %14 = arith.addf %6, %13 : vector<1x8x256xf32>
    %c0_10 = arith.constant 0 : index
    %c2 = arith.constant 2 : index
    %c0_11 = arith.constant 0 : index
    %15 = vector.load %arg1[%c0_10, %c2, %c0_11] : memref<1x4x256xf32, #tpu.memory_space<vmem>>, vector<1x1x256xf32>
    %c2_12 = arith.constant 2 : index
    %c0_13 = arith.constant 0 : index
    %c0_14 = arith.constant 0 : index
    %16 = vector.load %arg3[%c2_12, %c0_13, %c0_14] : memref<4x8x1xf32, #tpu.memory_space<vmem>>, vector<1x8x1xf32>
    %17 = vector.shape_cast %16 : vector<1x8x1xf32> to vector<8x1xf32>
    %18 = vector.shape_cast %17 : vector<8x1xf32> to vector<1x8x1xf32>
    %19 = vector.broadcast %15 : vector<1x1x256xf32> to vector<1x8x256xf32>
    %20 = vector.broadcast %18 : vector<1x8x1xf32> to vector<1x8x256xf32>
    %21 = arith.mulf %19, %20 : vector<1x8x256xf32>
    %22 = arith.addf %14, %21 : vector<1x8x256xf32>
    %c0_15 = arith.constant 0 : index
    %c3 = arith.constant 3 : index
    %c0_16 = arith.constant 0 : index
    %23 = vector.load %arg1[%c0_15, %c3, %c0_16] : memref<1x4x256xf32, #tpu.memory_space<vmem>>, vector<1x1x256xf32>
    %c3_17 = arith.constant 3 : index
    %c0_18 = arith.constant 0 : index
    %c0_19 = arith.constant 0 : index
    %24 = vector.load %arg3[%c3_17, %c0_18, %c0_19] : memref<4x8x1xf32, #tpu.memory_space<vmem>>, vector<1x8x1xf32>
    %25 = vector.shape_cast %24 : vector<1x8x1xf32> to vector<8x1xf32>
    %26 = vector.shape_cast %25 : vector<8x1xf32> to vector<1x8x1xf32>
    %27 = vector.broadcast %23 : vector<1x1x256xf32> to vector<1x8x256xf32>
    %28 = vector.broadcast %26 : vector<1x8x1xf32> to vector<1x8x256xf32>
    %29 = arith.mulf %27, %28 : vector<1x8x256xf32>
    %30 = arith.addf %22, %29 : vector<1x8x256xf32>
    %c0_20 = arith.constant 0 : index
    %c0_21 = arith.constant 0 : index
    %31 = vector.load %arg4[%c0_20, %c0_21] : memref<8x1xf32, #tpu.memory_space<vmem>>, vector<8x1xf32>
    %32 = vector.shape_cast %31 : vector<8x1xf32> to vector<1x8x1xf32>
    %33 = vector.broadcast %32 : vector<1x8x1xf32> to vector<1x8x256xf32>
    %34 = arith.addf %30, %33 : vector<1x8x256xf32>
    %35 = vector.shape_cast %34 : vector<1x8x256xf32> to vector<8x256xf32>
    %c0_22 = arith.constant 0 : index
    %c0_23 = arith.constant 0 : index
    %c0_24 = arith.constant 0 : index
    %36 = vector.load %arg5[%c0_22, %c0_23, %c0_24] : memref<9x8x1xf32, #tpu.memory_space<vmem>>, vector<9x8x1xf32>
    %37 = vector.extract_strided_slice %36 {offsets = [0, 0, 0], sizes = [1, 8, 1], strides = [1, 1, 1]} : vector<9x8x1xf32> to vector<1x8x1xf32>
    %38 = vector.shape_cast %37 : vector<1x8x1xf32> to vector<8x1xf32>
    %39 = vector.extract_strided_slice %36 {offsets = [1, 0, 0], sizes = [1, 8, 1], strides = [1, 1, 1]} : vector<9x8x1xf32> to vector<1x8x1xf32>
    %40 = vector.shape_cast %39 : vector<1x8x1xf32> to vector<8x1xf32>
    %41 = vector.extract_strided_slice %36 {offsets = [2, 0, 0], sizes = [1, 8, 1], strides = [1, 1, 1]} : vector<9x8x1xf32> to vector<1x8x1xf32>
    %42 = vector.shape_cast %41 : vector<1x8x1xf32> to vector<8x1xf32>
    %43 = vector.extract_strided_slice %36 {offsets = [3, 0, 0], sizes = [1, 8, 1], strides = [1, 1, 1]} : vector<9x8x1xf32> to vector<1x8x1xf32>
    %44 = vector.shape_cast %43 : vector<1x8x1xf32> to vector<8x1xf32>
    %45 = vector.extract_strided_slice %36 {offsets = [4, 0, 0], sizes = [1, 8, 1], strides = [1, 1, 1]} : vector<9x8x1xf32> to vector<1x8x1xf32>
    %46 = vector.shape_cast %45 : vector<1x8x1xf32> to vector<8x1xf32>
    %47 = vector.extract_strided_slice %36 {offsets = [5, 0, 0], sizes = [1, 8, 1], strides = [1, 1, 1]} : vector<9x8x1xf32> to vector<1x8x1xf32>
    %48 = vector.shape_cast %47 : vector<1x8x1xf32> to vector<8x1xf32>
    %49 = vector.extract_strided_slice %36 {offsets = [6, 0, 0], sizes = [1, 8, 1], strides = [1, 1, 1]} : vector<9x8x1xf32> to vector<1x8x1xf32>
    %50 = vector.shape_cast %49 : vector<1x8x1xf32> to vector<8x1xf32>
    %51 = vector.extract_strided_slice %36 {offsets = [7, 0, 0], sizes = [1, 8, 1], strides = [1, 1, 1]} : vector<9x8x1xf32> to vector<1x8x1xf32>
    %52 = vector.shape_cast %51 : vector<1x8x1xf32> to vector<8x1xf32>
    %53 = vector.extract_strided_slice %36 {offsets = [8, 0, 0], sizes = [1, 8, 1], strides = [1, 1, 1]} : vector<9x8x1xf32> to vector<1x8x1xf32>
    %54 = vector.shape_cast %53 : vector<1x8x1xf32> to vector<8x1xf32>
    %c0_25 = arith.constant 0 : index
    %c0_26 = arith.constant 0 : index
    %55 = vector.load %arg6[%c0_25, %c0_26] : memref<8x1xf32, #tpu.memory_space<vmem>>, vector<8x1xf32>
    %c17_i32 = arith.constant 17 : i32
    %56 = tpu.dynamic_rotate %35 by %c17_i32 dim 1 : vector<8x256xf32>, i32 -> vector<8x256xf32>
    %c0_27 = arith.constant 0 : index
    %c0_28 = arith.constant 0 : index
    %57 = vector.load %arg2[%c0_27, %c0_28] : memref<8x256xf32, #tpu.memory_space<vmem>>, vector<1x256xf32>
    %58 = vector.broadcast %57 : vector<1x256xf32> to vector<8x256xf32>
    %59 = arith.mulf %56, %58 : vector<8x256xf32>
    %60 = vector.broadcast %38 : vector<8x1xf32> to vector<8x256xf32>
    %61 = arith.mulf %59, %60 : vector<8x256xf32>
    %c16_i32 = arith.constant 16 : i32
    %62 = tpu.dynamic_rotate %35 by %c16_i32 dim 1 : vector<8x256xf32>, i32 -> vector<8x256xf32>
    %c1_29 = arith.constant 1 : index
    %c0_30 = arith.constant 0 : index
    %63 = vector.load %arg2[%c1_29, %c0_30] : memref<8x256xf32, #tpu.memory_space<vmem>>, vector<1x256xf32>
    %64 = vector.broadcast %63 : vector<1x256xf32> to vector<8x256xf32>
    %65 = arith.mulf %62, %64 : vector<8x256xf32>
    %66 = vector.broadcast %40 : vector<8x1xf32> to vector<8x256xf32>
    %67 = arith.mulf %65, %66 : vector<8x256xf32>
    %68 = arith.addf %61, %67 : vector<8x256xf32>
    %c15_i32 = arith.constant 15 : i32
    %69 = tpu.dynamic_rotate %35 by %c15_i32 dim 1 : vector<8x256xf32>, i32 -> vector<8x256xf32>
    %c2_31 = arith.constant 2 : index
    %c0_32 = arith.constant 0 : index
    %70 = vector.load %arg2[%c2_31, %c0_32] : memref<8x256xf32, #tpu.memory_space<vmem>>, vector<1x256xf32>
    %71 = vector.broadcast %70 : vector<1x256xf32> to vector<8x256xf32>
    %72 = arith.mulf %69, %71 : vector<8x256xf32>
    %73 = vector.broadcast %42 : vector<8x1xf32> to vector<8x256xf32>
    %74 = arith.mulf %72, %73 : vector<8x256xf32>
    %75 = arith.addf %68, %74 : vector<8x256xf32>
    %c1_i32 = arith.constant 1 : i32
    %76 = tpu.dynamic_rotate %35 by %c1_i32 dim 1 : vector<8x256xf32>, i32 -> vector<8x256xf32>
    %c3_33 = arith.constant 3 : index
    %c0_34 = arith.constant 0 : index
    %77 = vector.load %arg2[%c3_33, %c0_34] : memref<8x256xf32, #tpu.memory_space<vmem>>, vector<1x256xf32>
    %78 = vector.broadcast %77 : vector<1x256xf32> to vector<8x256xf32>
    %79 = arith.mulf %76, %78 : vector<8x256xf32>
    %80 = vector.broadcast %44 : vector<8x1xf32> to vector<8x256xf32>
    %81 = arith.mulf %79, %80 : vector<8x256xf32>
    %82 = arith.addf %75, %81 : vector<8x256xf32>
    %83 = vector.broadcast %46 : vector<8x1xf32> to vector<8x256xf32>
    %84 = arith.mulf %35, %83 : vector<8x256xf32>
    %85 = arith.addf %82, %84 : vector<8x256xf32>
    %c255_i32 = arith.constant 255 : i32
    %86 = tpu.dynamic_rotate %35 by %c255_i32 dim 1 : vector<8x256xf32>, i32 -> vector<8x256xf32>
    %c4 = arith.constant 4 : index
    %c0_35 = arith.constant 0 : index
    %87 = vector.load %arg2[%c4, %c0_35] : memref<8x256xf32, #tpu.memory_space<vmem>>, vector<1x256xf32>
    %88 = vector.broadcast %87 : vector<1x256xf32> to vector<8x256xf32>
    %89 = arith.mulf %86, %88 : vector<8x256xf32>
    %90 = vector.broadcast %48 : vector<8x1xf32> to vector<8x256xf32>
    %91 = arith.mulf %89, %90 : vector<8x256xf32>
    %92 = arith.addf %85, %91 : vector<8x256xf32>
    %c241_i32 = arith.constant 241 : i32
    %93 = tpu.dynamic_rotate %35 by %c241_i32 dim 1 : vector<8x256xf32>, i32 -> vector<8x256xf32>
    %c5 = arith.constant 5 : index
    %c0_36 = arith.constant 0 : index
    %94 = vector.load %arg2[%c5, %c0_36] : memref<8x256xf32, #tpu.memory_space<vmem>>, vector<1x256xf32>
    %95 = vector.broadcast %94 : vector<1x256xf32> to vector<8x256xf32>
    %96 = arith.mulf %93, %95 : vector<8x256xf32>
    %97 = vector.broadcast %50 : vector<8x1xf32> to vector<8x256xf32>
    %98 = arith.mulf %96, %97 : vector<8x256xf32>
    %99 = arith.addf %92, %98 : vector<8x256xf32>
    %c240_i32 = arith.constant 240 : i32
    %100 = tpu.dynamic_rotate %35 by %c240_i32 dim 1 : vector<8x256xf32>, i32 -> vector<8x256xf32>
    %c6 = arith.constant 6 : index
    %c0_37 = arith.constant 0 : index
    %101 = vector.load %arg2[%c6, %c0_37] : memref<8x256xf32, #tpu.memory_space<vmem>>, vector<1x256xf32>
    %102 = vector.broadcast %101 : vector<1x256xf32> to vector<8x256xf32>
    %103 = arith.mulf %100, %102 : vector<8x256xf32>
    %104 = vector.broadcast %52 : vector<8x1xf32> to vector<8x256xf32>
    %105 = arith.mulf %103, %104 : vector<8x256xf32>
    %106 = arith.addf %99, %105 : vector<8x256xf32>
    %c239_i32 = arith.constant 239 : i32
    %107 = tpu.dynamic_rotate %35 by %c239_i32 dim 1 : vector<8x256xf32>, i32 -> vector<8x256xf32>
    %c7 = arith.constant 7 : index
    %c0_38 = arith.constant 0 : index
    %108 = vector.load %arg2[%c7, %c0_38] : memref<8x256xf32, #tpu.memory_space<vmem>>, vector<1x256xf32>
    %109 = vector.broadcast %108 : vector<1x256xf32> to vector<8x256xf32>
    %110 = arith.mulf %107, %109 : vector<8x256xf32>
    %111 = vector.broadcast %54 : vector<8x1xf32> to vector<8x256xf32>
    %112 = arith.mulf %110, %111 : vector<8x256xf32>
    %113 = arith.addf %106, %112 : vector<8x256xf32>
    %114 = vector.broadcast %55 : vector<8x1xf32> to vector<8x256xf32>
    %115 = arith.addf %113, %114 : vector<8x256xf32>
    %cst = arith.constant dense<0.000000e+00> : vector<8xf32>
    %116 = vector.multi_reduction <add>, %115, %cst [1] : vector<8x256xf32> to vector<8xf32>
    %117 = vector.shape_cast %116 : vector<8xf32> to vector<8x1xf32>
    %cst_39 = arith.constant 2.560000e+02 : f32
    %118 = vector.broadcast %cst_39 : f32 to vector<8x1xf32>
    %119 = arith.divf %117, %118 : vector<8x1xf32>
    %120 = vector.broadcast %119 : vector<8x1xf32> to vector<8x256xf32>
    %121 = arith.subf %115, %120 : vector<8x256xf32>
    %122 = arith.mulf %121, %121 : vector<8x256xf32>
    %cst_40 = arith.constant dense<0.000000e+00> : vector<8xf32>
    %123 = vector.multi_reduction <add>, %122, %cst_40 [1] : vector<8x256xf32> to vector<8xf32>
    %124 = vector.shape_cast %123 : vector<8xf32> to vector<8x1xf32>
    %cst_41 = arith.constant 2.560000e+02 : f32
    %125 = vector.broadcast %cst_41 : f32 to vector<8x1xf32>
    %126 = arith.divf %124, %125 : vector<8x1xf32>
    %cst_42 = arith.constant 9.99999974E-6 : f32
    %127 = vector.broadcast %cst_42 : f32 to vector<8x1xf32>
    %128 = arith.addf %126, %127 : vector<8x1xf32>
    %129 = math.rsqrt %128 : vector<8x1xf32>
    %130 = vector.broadcast %129 : vector<8x1xf32> to vector<8x256xf32>
    %131 = arith.mulf %121, %130 : vector<8x256xf32>
    %cst_43 = arith.constant 0.000000e+00 : f32
    %132 = vector.broadcast %cst_43 : f32 to vector<8x256xf32>
    %133 = arith.maximumf %131, %132 : vector<8x256xf32>
    %134 = vector.shape_cast %133 : vector<8x256xf32> to vector<1x8x256xf32>
    %c0_44 = arith.constant 0 : index
    %c0_45 = arith.constant 0 : index
    %c0_46 = arith.constant 0 : index
    %135 = vector.load %arg12[%c0_44, %c0_45, %c0_46] : memref<1x8x256xf32, #tpu.memory_space<vmem>>, vector<1x8x256xf32>
    tpu.vector_store %arg12[%c0_44, %c0_45, %c0_46], %134 {strides = array<i32>} : memref<1x8x256xf32, #tpu.memory_space<vmem>>, vector<1x8x256xf32>,
    %c0_47 = arith.constant 0 : index
    %c0_48 = arith.constant 0 : index
    %c0_49 = arith.constant 0 : index
    %136 = vector.load %arg12[%c0_47, %c0_48, %c0_49] : memref<1x8x256xf32, #tpu.memory_space<vmem>>, vector<1x1x256xf32>
    %c0_50 = arith.constant 0 : index
    %c0_51 = arith.constant 0 : index
    %c0_52 = arith.constant 0 : index
    %137 = vector.load %arg7[%c0_50, %c0_51, %c0_52] : memref<8x8x1xf32, #tpu.memory_space<vmem>>, vector<1x8x1xf32>
    %138 = vector.shape_cast %137 : vector<1x8x1xf32> to vector<8x1xf32>
    %139 = vector.shape_cast %138 : vector<8x1xf32> to vector<1x8x1xf32>
    %140 = vector.broadcast %136 : vector<1x1x256xf32> to vector<1x8x256xf32>
    %141 = vector.broadcast %139 : vector<1x8x1xf32> to vector<1x8x256xf32>
    %142 = arith.mulf %140, %141 : vector<1x8x256xf32>
    %c0_53 = arith.constant 0 : index
    %c1_54 = arith.constant 1 : index
    %c0_55 = arith.constant 0 : index
    %143 = vector.load %arg12[%c0_53, %c1_54, %c0_55] : memref<1x8x256xf32, #tpu.memory_space<vmem>>, vector<1x1x256xf32>
    %c1_56 = arith.constant 1 : index
    %c0_57 = arith.constant 0 : index
    %c0_58 = arith.constant 0 : index
    %144 = vector.load %arg7[%c1_56, %c0_57, %c0_58] : memref<8x8x1xf32, #tpu.memory_space<vmem>>, vector<1x8x1xf32>
    %145 = vector.shape_cast %144 : vector<1x8x1xf32> to vector<8x1xf32>
    %146 = vector.shape_cast %145 : vector<8x1xf32> to vector<1x8x1xf32>
    %147 = vector.broadcast %143 : vector<1x1x256xf32> to vector<1x8x256xf32>
    %148 = vector.broadcast %146 : vector<1x8x1xf32> to vector<1x8x256xf32>
    %149 = arith.mulf %147, %148 : vector<1x8x256xf32>
    %150 = arith.addf %142, %149 : vector<1x8x256xf32>
    %c0_59 = arith.constant 0 : index
    %c2_60 = arith.constant 2 : index
    %c0_61 = arith.constant 0 : index
    %151 = vector.load %arg12[%c0_59, %c2_60, %c0_61] : memref<1x8x256xf32, #tpu.memory_space<vmem>>, vector<1x1x256xf32>
    %c2_62 = arith.constant 2 : index
    %c0_63 = arith.constant 0 : index
    %c0_64 = arith.constant 0 : index
    %152 = vector.load %arg7[%c2_62, %c0_63, %c0_64] : memref<8x8x1xf32, #tpu.memory_space<vmem>>, vector<1x8x1xf32>
    %153 = vector.shape_cast %152 : vector<1x8x1xf32> to vector<8x1xf32>
    %154 = vector.shape_cast %153 : vector<8x1xf32> to vector<1x8x1xf32>
    %155 = vector.broadcast %151 : vector<1x1x256xf32> to vector<1x8x256xf32>
    %156 = vector.broadcast %154 : vector<1x8x1xf32> to vector<1x8x256xf32>
    %157 = arith.mulf %155, %156 : vector<1x8x256xf32>
    %158 = arith.addf %150, %157 : vector<1x8x256xf32>
    %c0_65 = arith.constant 0 : index
    %c3_66 = arith.constant 3 : index
    %c0_67 = arith.constant 0 : index
    %159 = vector.load %arg12[%c0_65, %c3_66, %c0_67] : memref<1x8x256xf32, #tpu.memory_space<vmem>>, vector<1x1x256xf32>
    %c3_68 = arith.constant 3 : index
    %c0_69 = arith.constant 0 : index
    %c0_70 = arith.constant 0 : index
    %160 = vector.load %arg7[%c3_68, %c0_69, %c0_70] : memref<8x8x1xf32, #tpu.memory_space<vmem>>, vector<1x8x1xf32>
    %161 = vector.shape_cast %160 : vector<1x8x1xf32> to vector<8x1xf32>
    %162 = vector.shape_cast %161 : vector<8x1xf32> to vector<1x8x1xf32>
    %163 = vector.broadcast %159 : vector<1x1x256xf32> to vector<1x8x256xf32>
    %164 = vector.broadcast %162 : vector<1x8x1xf32> to vector<1x8x256xf32>
    %165 = arith.mulf %163, %164 : vector<1x8x256xf32>
    %166 = arith.addf %158, %165 : vector<1x8x256xf32>
    %c0_71 = arith.constant 0 : index
    %c4_72 = arith.constant 4 : index
    %c0_73 = arith.constant 0 : index
    %167 = vector.load %arg12[%c0_71, %c4_72, %c0_73] : memref<1x8x256xf32, #tpu.memory_space<vmem>>, vector<1x1x256xf32>
    %c4_74 = arith.constant 4 : index
    %c0_75 = arith.constant 0 : index
    %c0_76 = arith.constant 0 : index
    %168 = vector.load %arg7[%c4_74, %c0_75, %c0_76] : memref<8x8x1xf32, #tpu.memory_space<vmem>>, vector<1x8x1xf32>
    %169 = vector.shape_cast %168 : vector<1x8x1xf32> to vector<8x1xf32>
    %170 = vector.shape_cast %169 : vector<8x1xf32> to vector<1x8x1xf32>
    %171 = vector.broadcast %167 : vector<1x1x256xf32> to vector<1x8x256xf32>
    %172 = vector.broadcast %170 : vector<1x8x1xf32> to vector<1x8x256xf32>
    %173 = arith.mulf %171, %172 : vector<1x8x256xf32>
    %174 = arith.addf %166, %173 : vector<1x8x256xf32>
    %c0_77 = arith.constant 0 : index
    %c5_78 = arith.constant 5 : index
    %c0_79 = arith.constant 0 : index
    %175 = vector.load %arg12[%c0_77, %c5_78, %c0_79] : memref<1x8x256xf32, #tpu.memory_space<vmem>>, vector<1x1x256xf32>
    %c5_80 = arith.constant 5 : index
    %c0_81 = arith.constant 0 : index
    %c0_82 = arith.constant 0 : index
    %176 = vector.load %arg7[%c5_80, %c0_81, %c0_82] : memref<8x8x1xf32, #tpu.memory_space<vmem>>, vector<1x8x1xf32>
    %177 = vector.shape_cast %176 : vector<1x8x1xf32> to vector<8x1xf32>
    %178 = vector.shape_cast %177 : vector<8x1xf32> to vector<1x8x1xf32>
    %179 = vector.broadcast %175 : vector<1x1x256xf32> to vector<1x8x256xf32>
    %180 = vector.broadcast %178 : vector<1x8x1xf32> to vector<1x8x256xf32>
    %181 = arith.mulf %179, %180 : vector<1x8x256xf32>
    %182 = arith.addf %174, %181 : vector<1x8x256xf32>
    %c0_83 = arith.constant 0 : index
    %c6_84 = arith.constant 6 : index
    %c0_85 = arith.constant 0 : index
    %183 = vector.load %arg12[%c0_83, %c6_84, %c0_85] : memref<1x8x256xf32, #tpu.memory_space<vmem>>, vector<1x1x256xf32>
    %c6_86 = arith.constant 6 : index
    %c0_87 = arith.constant 0 : index
    %c0_88 = arith.constant 0 : index
    %184 = vector.load %arg7[%c6_86, %c0_87, %c0_88] : memref<8x8x1xf32, #tpu.memory_space<vmem>>, vector<1x8x1xf32>
    %185 = vector.shape_cast %184 : vector<1x8x1xf32> to vector<8x1xf32>
    %186 = vector.shape_cast %185 : vector<8x1xf32> to vector<1x8x1xf32>
    %187 = vector.broadcast %183 : vector<1x1x256xf32> to vector<1x8x256xf32>
    %188 = vector.broadcast %186 : vector<1x8x1xf32> to vector<1x8x256xf32>
    %189 = arith.mulf %187, %188 : vector<1x8x256xf32>
    %190 = arith.addf %182, %189 : vector<1x8x256xf32>
    %c0_89 = arith.constant 0 : index
    %c7_90 = arith.constant 7 : index
    %c0_91 = arith.constant 0 : index
    %191 = vector.load %arg12[%c0_89, %c7_90, %c0_91] : memref<1x8x256xf32, #tpu.memory_space<vmem>>, vector<1x1x256xf32>
    %c7_92 = arith.constant 7 : index
    %c0_93 = arith.constant 0 : index
    %c0_94 = arith.constant 0 : index
    %192 = vector.load %arg7[%c7_92, %c0_93, %c0_94] : memref<8x8x1xf32, #tpu.memory_space<vmem>>, vector<1x8x1xf32>
    %193 = vector.shape_cast %192 : vector<1x8x1xf32> to vector<8x1xf32>
    %194 = vector.shape_cast %193 : vector<8x1xf32> to vector<1x8x1xf32>
    %195 = vector.broadcast %191 : vector<1x1x256xf32> to vector<1x8x256xf32>
    %196 = vector.broadcast %194 : vector<1x8x1xf32> to vector<1x8x256xf32>
    %197 = arith.mulf %195, %196 : vector<1x8x256xf32>
    %198 = arith.addf %190, %197 : vector<1x8x256xf32>
    %c0_95 = arith.constant 0 : index
    %c0_96 = arith.constant 0 : index
    %199 = vector.load %arg8[%c0_95, %c0_96] : memref<8x1xf32, #tpu.memory_space<vmem>>, vector<8x1xf32>
    %200 = vector.shape_cast %199 : vector<8x1xf32> to vector<1x8x1xf32>
    %201 = vector.broadcast %200 : vector<1x8x1xf32> to vector<1x8x256xf32>
    %202 = arith.addf %198, %201 : vector<1x8x256xf32>
    %203 = vector.shape_cast %202 : vector<1x8x256xf32> to vector<8x256xf32>
    %c0_97 = arith.constant 0 : index
    %c0_98 = arith.constant 0 : index
    %c0_99 = arith.constant 0 : index
    %204 = vector.load %arg9[%c0_97, %c0_98, %c0_99] : memref<9x8x1xf32, #tpu.memory_space<vmem>>, vector<9x8x1xf32>
    %205 = vector.extract_strided_slice %204 {offsets = [0, 0, 0], sizes = [1, 8, 1], strides = [1, 1, 1]} : vector<9x8x1xf32> to vector<1x8x1xf32>
    %206 = vector.shape_cast %205 : vector<1x8x1xf32> to vector<8x1xf32>
    %207 = vector.extract_strided_slice %204 {offsets = [1, 0, 0], sizes = [1, 8, 1], strides = [1, 1, 1]} : vector<9x8x1xf32> to vector<1x8x1xf32>
    %208 = vector.shape_cast %207 : vector<1x8x1xf32> to vector<8x1xf32>
    %209 = vector.extract_strided_slice %204 {offsets = [2, 0, 0], sizes = [1, 8, 1], strides = [1, 1, 1]} : vector<9x8x1xf32> to vector<1x8x1xf32>
    %210 = vector.shape_cast %209 : vector<1x8x1xf32> to vector<8x1xf32>
    %211 = vector.extract_strided_slice %204 {offsets = [3, 0, 0], sizes = [1, 8, 1], strides = [1, 1, 1]} : vector<9x8x1xf32> to vector<1x8x1xf32>
    %212 = vector.shape_cast %211 : vector<1x8x1xf32> to vector<8x1xf32>
    %213 = vector.extract_strided_slice %204 {offsets = [4, 0, 0], sizes = [1, 8, 1], strides = [1, 1, 1]} : vector<9x8x1xf32> to vector<1x8x1xf32>
    %214 = vector.shape_cast %213 : vector<1x8x1xf32> to vector<8x1xf32>
    %215 = vector.extract_strided_slice %204 {offsets = [5, 0, 0], sizes = [1, 8, 1], strides = [1, 1, 1]} : vector<9x8x1xf32> to vector<1x8x1xf32>
    %216 = vector.shape_cast %215 : vector<1x8x1xf32> to vector<8x1xf32>
    %217 = vector.extract_strided_slice %204 {offsets = [6, 0, 0], sizes = [1, 8, 1], strides = [1, 1, 1]} : vector<9x8x1xf32> to vector<1x8x1xf32>
    %218 = vector.shape_cast %217 : vector<1x8x1xf32> to vector<8x1xf32>
    %219 = vector.extract_strided_slice %204 {offsets = [7, 0, 0], sizes = [1, 8, 1], strides = [1, 1, 1]} : vector<9x8x1xf32> to vector<1x8x1xf32>
    %220 = vector.shape_cast %219 : vector<1x8x1xf32> to vector<8x1xf32>
    %221 = vector.extract_strided_slice %204 {offsets = [8, 0, 0], sizes = [1, 8, 1], strides = [1, 1, 1]} : vector<9x8x1xf32> to vector<1x8x1xf32>
    %222 = vector.shape_cast %221 : vector<1x8x1xf32> to vector<8x1xf32>
    %c0_100 = arith.constant 0 : index
    %c0_101 = arith.constant 0 : index
    %223 = vector.load %arg10[%c0_100, %c0_101] : memref<8x1xf32, #tpu.memory_space<vmem>>, vector<8x1xf32>
    %c17_i32_102 = arith.constant 17 : i32
    %224 = tpu.dynamic_rotate %203 by %c17_i32_102 dim 1 : vector<8x256xf32>, i32 -> vector<8x256xf32>
    %c0_103 = arith.constant 0 : index
    %c0_104 = arith.constant 0 : index
    %225 = vector.load %arg2[%c0_103, %c0_104] : memref<8x256xf32, #tpu.memory_space<vmem>>, vector<1x256xf32>
    %226 = vector.broadcast %225 : vector<1x256xf32> to vector<8x256xf32>
    %227 = arith.mulf %224, %226 : vector<8x256xf32>
    %228 = vector.broadcast %206 : vector<8x1xf32> to vector<8x256xf32>
    %229 = arith.mulf %227, %228 : vector<8x256xf32>
    %c16_i32_105 = arith.constant 16 : i32
    %230 = tpu.dynamic_rotate %203 by %c16_i32_105 dim 1 : vector<8x256xf32>, i32 -> vector<8x256xf32>
    %c1_106 = arith.constant 1 : index
    %c0_107 = arith.constant 0 : index
    %231 = vector.load %arg2[%c1_106, %c0_107] : memref<8x256xf32, #tpu.memory_space<vmem>>, vector<1x256xf32>
    %232 = vector.broadcast %231 : vector<1x256xf32> to vector<8x256xf32>
    %233 = arith.mulf %230, %232 : vector<8x256xf32>
    %234 = vector.broadcast %208 : vector<8x1xf32> to vector<8x256xf32>
    %235 = arith.mulf %233, %234 : vector<8x256xf32>
    %236 = arith.addf %229, %235 : vector<8x256xf32>
    %c15_i32_108 = arith.constant 15 : i32
    %237 = tpu.dynamic_rotate %203 by %c15_i32_108 dim 1 : vector<8x256xf32>, i32 -> vector<8x256xf32>
    %c2_109 = arith.constant 2 : index
    %c0_110 = arith.constant 0 : index
    %238 = vector.load %arg2[%c2_109, %c0_110] : memref<8x256xf32, #tpu.memory_space<vmem>>, vector<1x256xf32>
    %239 = vector.broadcast %238 : vector<1x256xf32> to vector<8x256xf32>
    %240 = arith.mulf %237, %239 : vector<8x256xf32>
    %241 = vector.broadcast %210 : vector<8x1xf32> to vector<8x256xf32>
    %242 = arith.mulf %240, %241 : vector<8x256xf32>
    %243 = arith.addf %236, %242 : vector<8x256xf32>
    %c1_i32_111 = arith.constant 1 : i32
    %244 = tpu.dynamic_rotate %203 by %c1_i32_111 dim 1 : vector<8x256xf32>, i32 -> vector<8x256xf32>
    %c3_112 = arith.constant 3 : index
    %c0_113 = arith.constant 0 : index
    %245 = vector.load %arg2[%c3_112, %c0_113] : memref<8x256xf32, #tpu.memory_space<vmem>>, vector<1x256xf32>
    %246 = vector.broadcast %245 : vector<1x256xf32> to vector<8x256xf32>
    %247 = arith.mulf %244, %246 : vector<8x256xf32>
    %248 = vector.broadcast %212 : vector<8x1xf32> to vector<8x256xf32>
    %249 = arith.mulf %247, %248 : vector<8x256xf32>
    %250 = arith.addf %243, %249 : vector<8x256xf32>
    %251 = vector.broadcast %214 : vector<8x1xf32> to vector<8x256xf32>
    %252 = arith.mulf %203, %251 : vector<8x256xf32>
    %253 = arith.addf %250, %252 : vector<8x256xf32>
    %c255_i32_114 = arith.constant 255 : i32
    %254 = tpu.dynamic_rotate %203 by %c255_i32_114 dim 1 : vector<8x256xf32>, i32 -> vector<8x256xf32>
    %c4_115 = arith.constant 4 : index
    %c0_116 = arith.constant 0 : index
    %255 = vector.load %arg2[%c4_115, %c0_116] : memref<8x256xf32, #tpu.memory_space<vmem>>, vector<1x256xf32>
    %256 = vector.broadcast %255 : vector<1x256xf32> to vector<8x256xf32>
    %257 = arith.mulf %254, %256 : vector<8x256xf32>
    %258 = vector.broadcast %216 : vector<8x1xf32> to vector<8x256xf32>
    %259 = arith.mulf %257, %258 : vector<8x256xf32>
    %260 = arith.addf %253, %259 : vector<8x256xf32>
    %c241_i32_117 = arith.constant 241 : i32
    %261 = tpu.dynamic_rotate %203 by %c241_i32_117 dim 1 : vector<8x256xf32>, i32 -> vector<8x256xf32>
    %c5_118 = arith.constant 5 : index
    %c0_119 = arith.constant 0 : index
    %262 = vector.load %arg2[%c5_118, %c0_119] : memref<8x256xf32, #tpu.memory_space<vmem>>, vector<1x256xf32>
    %263 = vector.broadcast %262 : vector<1x256xf32> to vector<8x256xf32>
    %264 = arith.mulf %261, %263 : vector<8x256xf32>
    %265 = vector.broadcast %218 : vector<8x1xf32> to vector<8x256xf32>
    %266 = arith.mulf %264, %265 : vector<8x256xf32>
    %267 = arith.addf %260, %266 : vector<8x256xf32>
    %c240_i32_120 = arith.constant 240 : i32
    %268 = tpu.dynamic_rotate %203 by %c240_i32_120 dim 1 : vector<8x256xf32>, i32 -> vector<8x256xf32>
    %c6_121 = arith.constant 6 : index
    %c0_122 = arith.constant 0 : index
    %269 = vector.load %arg2[%c6_121, %c0_122] : memref<8x256xf32, #tpu.memory_space<vmem>>, vector<1x256xf32>
    %270 = vector.broadcast %269 : vector<1x256xf32> to vector<8x256xf32>
    %271 = arith.mulf %268, %270 : vector<8x256xf32>
    %272 = vector.broadcast %220 : vector<8x1xf32> to vector<8x256xf32>
    %273 = arith.mulf %271, %272 : vector<8x256xf32>
    %274 = arith.addf %267, %273 : vector<8x256xf32>
    %c239_i32_123 = arith.constant 239 : i32
    %275 = tpu.dynamic_rotate %203 by %c239_i32_123 dim 1 : vector<8x256xf32>, i32 -> vector<8x256xf32>
    %c7_124 = arith.constant 7 : index
    %c0_125 = arith.constant 0 : index
    %276 = vector.load %arg2[%c7_124, %c0_125] : memref<8x256xf32, #tpu.memory_space<vmem>>, vector<1x256xf32>
    %277 = vector.broadcast %276 : vector<1x256xf32> to vector<8x256xf32>
    %278 = arith.mulf %275, %277 : vector<8x256xf32>
    %279 = vector.broadcast %222 : vector<8x1xf32> to vector<8x256xf32>
    %280 = arith.mulf %278, %279 : vector<8x256xf32>
    %281 = arith.addf %274, %280 : vector<8x256xf32>
    %282 = vector.broadcast %223 : vector<8x1xf32> to vector<8x256xf32>
    %283 = arith.addf %281, %282 : vector<8x256xf32>
    %cst_126 = arith.constant dense<0.000000e+00> : vector<8xf32>
    %284 = vector.multi_reduction <add>, %283, %cst_126 [1] : vector<8x256xf32> to vector<8xf32>
    %285 = vector.shape_cast %284 : vector<8xf32> to vector<8x1xf32>
    %cst_127 = arith.constant 2.560000e+02 : f32
    %286 = vector.broadcast %cst_127 : f32 to vector<8x1xf32>
    %287 = arith.divf %285, %286 : vector<8x1xf32>
    %288 = vector.broadcast %287 : vector<8x1xf32> to vector<8x256xf32>
    %289 = arith.subf %283, %288 : vector<8x256xf32>
    %290 = arith.mulf %289, %289 : vector<8x256xf32>
    %cst_128 = arith.constant dense<0.000000e+00> : vector<8xf32>
    %291 = vector.multi_reduction <add>, %290, %cst_128 [1] : vector<8x256xf32> to vector<8xf32>
    %292 = vector.shape_cast %291 : vector<8xf32> to vector<8x1xf32>
    %cst_129 = arith.constant 2.560000e+02 : f32
    %293 = vector.broadcast %cst_129 : f32 to vector<8x1xf32>
    %294 = arith.divf %292, %293 : vector<8x1xf32>
    %cst_130 = arith.constant 9.99999974E-6 : f32
    %295 = vector.broadcast %cst_130 : f32 to vector<8x1xf32>
    %296 = arith.addf %294, %295 : vector<8x1xf32>
    %297 = math.rsqrt %296 : vector<8x1xf32>
    %298 = vector.broadcast %297 : vector<8x1xf32> to vector<8x256xf32>
    %299 = arith.mulf %289, %298 : vector<8x256xf32>
    %cst_131 = arith.constant 0.000000e+00 : f32
    %300 = vector.broadcast %cst_131 : f32 to vector<8x256xf32>
    %301 = arith.maximumf %299, %300 : vector<8x256xf32>
    %302 = vector.shape_cast %301 : vector<8x256xf32> to vector<1x8x256xf32>
    %c0_132 = arith.constant 0 : index
    %c0_133 = arith.constant 0 : index
    %c0_134 = arith.constant 0 : index
    %303 = vector.load %arg11[%c0_132, %c0_133, %c0_134] : memref<1x8x256xf32, #tpu.memory_space<vmem>>, vector<1x8x256xf32>
    tpu.vector_store %arg11[%c0_132, %c0_133, %c0_134], %302 {strides = array<i32>} : memref<1x8x256xf32, #tpu.memory_space<vmem>>, vector<1x8x256xf32>,
    return
  }
  func.func @transform_0(%arg0: i32) -> (i32, i32, i32) {
    %c0_i32 = arith.constant 0 : i32
    %c0_i32_0 = arith.constant 0 : i32
    %c0_i32_1 = arith.constant 0 : i32
    return %arg0, %c0_i32, %c0_i32_0 : i32, i32, i32
  }
  func.func @transform_1(%arg0: i32) -> (i32, i32) {
    %c0_i32 = arith.constant 0 : i32
    %c0_i32_0 = arith.constant 0 : i32
    %c0_i32_1 = arith.constant 0 : i32
    return %c0_i32, %c0_i32_0 : i32, i32
  }
  func.func @transform_2(%arg0: i32) -> (i32, i32, i32) {
    %c0_i32 = arith.constant 0 : i32
    %c0_i32_0 = arith.constant 0 : i32
    %c0_i32_1 = arith.constant 0 : i32
    %c0_i32_2 = arith.constant 0 : i32
    return %c0_i32, %c0_i32_0, %c0_i32_1 : i32, i32, i32
  }
  func.func @transform_3(%arg0: i32) -> (i32, i32) {
    %c0_i32 = arith.constant 0 : i32
    %c0_i32_0 = arith.constant 0 : i32
    %c0_i32_1 = arith.constant 0 : i32
    return %c0_i32, %c0_i32_0 : i32, i32
  }
  func.func @transform_4(%arg0: i32) -> (i32, i32, i32) {
    %c0_i32 = arith.constant 0 : i32
    %c0_i32_0 = arith.constant 0 : i32
    %c0_i32_1 = arith.constant 0 : i32
    %c0_i32_2 = arith.constant 0 : i32
    return %c0_i32, %c0_i32_0, %c0_i32_1 : i32, i32, i32
  }
  func.func @transform_5(%arg0: i32) -> (i32, i32) {
    %c0_i32 = arith.constant 0 : i32
    %c0_i32_0 = arith.constant 0 : i32
    %c0_i32_1 = arith.constant 0 : i32
    return %c0_i32, %c0_i32_0 : i32, i32
  }
  func.func @transform_6(%arg0: i32) -> (i32, i32, i32) {
    %c0_i32 = arith.constant 0 : i32
    %c0_i32_0 = arith.constant 0 : i32
    %c0_i32_1 = arith.constant 0 : i32
    %c0_i32_2 = arith.constant 0 : i32
    return %c0_i32, %c0_i32_0, %c0_i32_1 : i32, i32, i32
  }
  func.func @transform_7(%arg0: i32) -> (i32, i32) {
    %c0_i32 = arith.constant 0 : i32
    %c0_i32_0 = arith.constant 0 : i32
    %c0_i32_1 = arith.constant 0 : i32
    return %c0_i32, %c0_i32_0 : i32, i32
  }
  func.func @transform_8(%arg0: i32) -> (i32, i32, i32) {
    %c0_i32 = arith.constant 0 : i32
    %c0_i32_0 = arith.constant 0 : i32
    %c0_i32_1 = arith.constant 0 : i32
    %c0_i32_2 = arith.constant 0 : i32
    return %c0_i32, %c0_i32_0, %c0_i32_1 : i32, i32, i32
  }
  func.func @transform_9(%arg0: i32) -> (i32, i32) {
    %c0_i32 = arith.constant 0 : i32
    %c0_i32_0 = arith.constant 0 : i32
    %c0_i32_1 = arith.constant 0 : i32
    return %c0_i32, %c0_i32_0 : i32, i32
  }
  func.func @transform_10(%arg0: i32) -> (i32, i32, i32) {
    %c0_i32 = arith.constant 0 : i32
    %c0_i32_0 = arith.constant 0 : i32
    %c0_i32_1 = arith.constant 0 : i32
    return %arg0, %c0_i32, %c0_i32_0 : i32, i32, i32
  }
}

</mosaic_0001>

<bundles_post_ra>
// kernel: conv_block_forward.1
= control target key start
LH: loop header
LB: loop body
LE: loop exit
PB: predicated region body
PF: predicated region fallthrough
CT: control target
= control target key end

     0   :  { %s1416_s13 = smov 0   ;;  %s1847_s0 = inlined_call_operand.vmem [shape: f32[2,4,256], index: 0, kind: input, shape index: {}]   ;;  %s1848_s1 = inlined_call_operand.vmem [shape: f32[8,256], index: 1, kind: input, shape index: {}]   ;;  %s1849_s2 = inlined_call_operand.vmem [shape: f32[4,8,1], index: 2, kind: input, shape index: {}]   ;;  %s1850_s3 = inlined_call_operand.vmem [shape: f32[8,1], index: 3, kind: input, shape index: {}]   ;;  %s1851_s4 = inlined_call_operand.vmem [shape: f32[9,8,1], index: 4, kind: input, shape index: {}]   ;;  %s1852_s5 = inlined_call_operand.vmem [shape: f32[8,1], index: 5, kind: input, shape index: {}]   ;;  %s1853_s6 = inlined_call_operand.vmem [shape: f32[8,8,1], index: 6, kind: input, shape index: {}]   ;;  %s1854_s7 = inlined_call_operand.vmem [shape: f32[8,1], index: 7, kind: input, shape index: {}]   ;;  %s1855_s8 = inlined_call_operand.vmem [shape: f32[9,8,1], index: 8, kind: input, shape index: {}]   ;;  %s1856_s9 = inlined_call_operand.vmem [shape: f32[8,1], index: 9, kind: input, shape index: {}]   ;;  %s1857_s10 = inlined_call_operand.vmem [shape: f32[2,8,256], index: 10, kind: output, shape index: {}]  }
   0x1 LB: > { %s1281_s14 = sadd.s32 4294967295, %s1350_s13   ;;  %p1285_p0 = scmp.ge.s32.totalorder %s1350_s13, 1  ;;  %s1350_s13 = sphi %s1416_s13, %s20_s13  }
   0x2   : > { %p312_p1 = scmp.lt.s32.totalorder %s1350_s13, 3 }
   0x4   : > { %p313_p2 = pnand %p1285_p0, %p312_p1 }
   0x5   : > { %v1293_v0 = vld [vmem:[%s1849_s2 + $0x10] sm:$0xff] (!%p313_p2)  ;;  %v361_v1 = vld [vmem:[%s1849_s2] sm:$0xff] (!%p313_p2)  ;;  %v1352_v2 = vmov (!%p313_p2), 0   ;;  %v1295_v3 = vld [vmem:[%s1849_s2 + $0x18] sm:$0xff] (!%p313_p2)  ;;  %p350_p3 = scmp.lt.s32.totalorder (!%p313_p2), %s1281_s14, 1  ;;  %v363_v15 = vlaneseq (!%p313_p2)  ;;  %s1353_s29 = smov (!%p313_p2), 17  }
   0x6   : > { %316 = sbr.rel (%p313_p2) target bundleno = 1128 (0x468), region = 60  ;;  %1339 = vset.pattern.permute.xlu1 (!%p313_p2), %v1352_v2  ;;  %1338 = vset.pattern.permute.xlu0 (!%p313_p2), %v1352_v2  ;;  %v1291_v4 = vld [vmem:[%s1849_s2 + $0x8] sm:$0xff] (!%p313_p2)  ;;  %v460_v5 = vld [vmem:[%s1851_s4] sm:$0xff] (!%p313_p2)  ;;  %v462_v7 = vld [vmem:[%s1851_s4 + $0x10] sm:$0xff] (!%p313_p2)  ;;  %s1354_s30 = smov (!%p313_p2), 16  }
   0x7   : > { %421 = vperm.xlu1 (!%p313_p2), %1339, %v1293_v0   ;;  %375 = vperm.xlu0 (!%p313_p2), %1338, %v361_v1   ;;  %v452_v6 = vld [vmem:[%s1850_s3] sm:$0xff] (!%p313_p2)  ;;  %v461_v8 = vld [vmem:[%s1851_s4 + $0x8] sm:$0xff] (!%p313_p2)  ;;  %v463_v10 = vld [vmem:[%s1851_s4 + $0x18] sm:$0xff] (!%p313_p2)  ;;  %v364_v16 = vshrl.u32 (!%p313_p2), %v363_v15, 7  ;;  %s1355_s11 = smov (!%p313_p2), 15   ;;  %s1356_s12 = smov (!%p313_p2), 1  }
   0x8   : > { %v464_v9 = vld [vmem:[%s1851_s4 + $0x20] sm:$0xff] (!%p313_p2)  ;;  %v466_v11 = vld [vmem:[%s1851_s4 + $0x30] sm:$0xff] (!%p313_p2)  ;;  %v465_v12 = vld [vmem:[%s1851_s4 + $0x28] sm:$0xff] (!%p313_p2)  ;;  %s1357_s15 = smov (!%p313_p2), 127   ;;  %s1358_s16 = smov (!%p313_p2), 113  }
   0x9   : > { %v468_v13 = vld [vmem:[%s1851_s4 + $0x40] sm:$0xff] (!%p313_p2)  ;;  %v467_v14 = vld [vmem:[%s1851_s4 + $0x38] sm:$0xff] (!%p313_p2)  ;;  %v1477_v17 = vsub.s32 (!%p313_p2), 0, %v364_v16  ;;  %v1479_v18 = vsub.s32 (!%p313_p2), 1, %v364_v16  ;;  %s1359_s17 = smov (!%p313_p2), 112   ;;  %s1360_s18 = smov (!%p313_p2), 111  }
   0xa   : > { %v469_v52 = vld [vmem:[%s1852_s5] sm:$0xff] (!%p313_p2) }
   0xb   : > { %445 = vperm.xlu1 (!%p313_p2), %1339, %v1295_v3   ;;  %397 = vperm.xlu0 (!%p313_p2), %1338, %v1291_v4   ;;  %v1541_v4 = vand.u32 (!%p313_p2), 127, %v363_v15  ;;  %v1298_v15 = vld [vmem:[%s1848_s1 + $0x3] ss:$8 sm:$0x3] (!%p313_p2) }
   0xd   : > { %s1859_s14 = smov (!%p350_p3, %s1281_s14), 1  ;;  %vm504_vm0 = vcmp.lt.s32.totalorder %v1541_v4, 16  ;;  %vm476_vm1 = vcmp.lt.s32.totalorder %v1541_v4, 17  ;;  %vm535_vm2 = vcmp.lt.s32.totalorder %v1541_v4, 15  ;;  %vm566_vm3 = vcmp.lt.s32.totalorder %v1541_v4, 1 }
   0xe   : > { %s1319_s25 = sshll.u32 %s1859_s14, 3  ;;  %vm606_vm4 = vcmp.lt.s32.totalorder %v1541_v4, 127  ;;  %vm637_vm5 = vcmp.lt.s32.totalorder %v1541_v4, 113  ;;  %vm668_vm6 = vcmp.lt.s32.totalorder %v1541_v4, 112  ;;  %vm699_vm7 = vcmp.lt.s32.totalorder %v1541_v4, 111 }
   0xf   : > { %495 = vperm.xlu1 %1339, %v460_v5   ;;  %455 = vperm.xlu0 %1338, %v452_v6   ;;  %s354_s28 = scalar_lea.vmem %s1847_s0, %s1319_s25  ;;  %v1296_v5 = vld [vmem:[%s1848_s1 + $0x1] ss:$8 sm:$0x3]  ;;  %v479_v6 = vld [vmem:[%s1848_s1] ss:$8 sm:$0x3] }
  0x10   : > { %v360_v19 = vld [vmem:[%s354_s28] ss:$4 sm:$0x3]  ;;  %v1290_v20 = vld [vmem:[%s354_s28 + $0x1] ss:$4 sm:$0x3]  ;;  %v488_v16 = vrot.slane %v479_v6, %v1479_v18 }
  0x11   : > { %v1292_v22 = vld [vmem:[%s354_s28 + $0x2] ss:$4 sm:$0x3]  ;;  %v366_v24 = vrot.slane %v360_v19, %v1477_v17  ;;  %v370_v25 = vrot.slane %v360_v19, %v1479_v18  ;;  %v1294_v26 = vld [vmem:[%s354_s28 + $0x3] ss:$4 sm:$0x3]  ;;  %v388_v27 = vrot.slane %v1290_v20, %v1477_v17  ;;  %v392_v28 = vrot.slane %v1290_v20, %v1479_v18 }
  0x12   : > { %v412_v29 = vrot.slane %v1292_v22, %v1477_v17  ;;  %v416_v30 = vrot.slane %v1292_v22, %v1479_v18  ;;  %v436_v31 = vrot.slane %v1294_v26, %v1477_v17  ;;  %v440_v32 = vrot.slane %v1294_v26, %v1479_v18 }
  0x13   : > { %555 = vperm.xlu1 %1339, %v462_v7   ;;  %524 = vperm.xlu0 %1338, %v461_v8   ;;  %v1297_v7 = vld [vmem:[%s1848_s1 + $0x2] ss:$8 sm:$0x3] }
  0x14   : > { %v544_v19 = vrot.slane %v1297_v7, %v1477_v17  ;;  %v548_v20 = vrot.slane %v1297_v7, %v1479_v18 }
  0x17   : > { %595 = vperm.xlu1 %1339, %v464_v9   ;;  %586 = vperm.xlu0 %1338, %v463_v10   ;;  %v513_v10 = vrot.slane %v1296_v5, %v1477_v17 }
  0x1b   : > { %657 = vperm.xlu1 %1339, %v466_v11   ;;  %626 = vperm.xlu0 %1338, %v465_v12   ;;  %v517_v11 = vrot.slane %v1296_v5, %v1479_v18  ;;  %v484_v12 = vrot.slane %v479_v6, %v1477_v17 }
  0x1f   : > { %719 = vperm.xlu1 %1339, %v468_v13   ;;  %688 = vperm.xlu0 %1338, %v467_v14  }
  0x86   : > { %v422_v21 = vpop.permute.xlu1 %421  ;;  %v376_v23 = vpop.permute.xlu0 %375 }
  0x87   : > { %v378_v34 = vmul.f32 %v376_v23, %v366_v24  ;;  %v379_v35 = vmul.f32 %v376_v23, %v370_v25  ;;  %v424_v39 = vmul.f32 %v422_v21, %v412_v29  ;;  %v425_v40 = vmul.f32 %v422_v21, %v416_v30 }
  0x88   : > { %v575_v29 = vrot.slane %v1298_v15, %v1477_v17  ;;  %v579_v30 = vrot.slane %v1298_v15, %v1479_v18 }
  0x8a   : > { %v398_v33 = vpop.permute.xlu0 %397  ;;  %v446_v38 = vpop.permute.xlu1 %445 }
  0x8b   : > { %v400_v36 = vmul.f32 %v398_v33, %v388_v27  ;;  %v401_v37 = vmul.f32 %v398_v33, %v392_v28  ;;  %v448_v43 = vmul.f32 %v446_v38, %v436_v31  ;;  %v449_v44 = vmul.f32 %v446_v38, %v440_v32 }
  0x8d   : > { %v402_v41 = vadd.f32 %v400_v36, %v378_v34  ;;  %v403_v42 = vadd.f32 %v401_v37, %v379_v35 }
  0x8e   : > { %v456_v49 = vpop.permute.xlu0 %455  ;;  %v496_v53 = vpop.permute.xlu1 %495 }
  0x8f   : > { %v426_v45 = vadd.f32 %v424_v39, %v402_v41  ;;  %v427_v46 = vadd.f32 %v425_v40, %v403_v42 }
  0x91   : > { %v450_v47 = vadd.f32 %v448_v43, %v426_v45  ;;  %v451_v48 = vadd.f32 %v449_v44, %v427_v46 }
  0x92   : > { %v556_v54 = vpop.permute.xlu1 %555  ;;  %v525_v55 = vpop.permute.xlu0 %524 }
  0x93   : > { %v1489_v50 = vadd.f32 %v456_v49, %v450_v47  ;;  %v1491_v51 = vadd.f32 %v456_v49, %v451_v48  ;;  %v1299_v47 = vld [vmem:[%s1848_s1 + $0x4] ss:$8 sm:$0x3] }
  0x95   : > { %472 = vrot.lane.b32.xlu1 %v1491_v51, %s1353_s29  ;;  %470 = vrot.lane.b32.xlu0 %v1489_v50, %s1353_s29 }
  0x96   : > { %v1528_v56 = vpop.permute.xlu1 %595  ;;  %v1530_v57 = vpop.permute.xlu0 %586 }
  0x99   : > { %502 = vrot.lane.b32.xlu1 %v1491_v51, %s1354_s30  ;;  %500 = vrot.lane.b32.xlu0 %v1489_v50, %s1354_s30 }
  0x9a   : > { %v1532_v58 = vpop.permute.xlu1 %657  ;;  %v1534_v59 = vpop.permute.xlu0 %626 }
  0x9d   : > { %531 = vrot.lane.b32.xlu1 %v1489_v50, %s1355_s11  ;;  %533 = vrot.lane.b32.xlu0 %v1491_v51, %s1355_s11 }
  0x9e   : > { %v1536_v60 = vpop.permute.xlu1 %719  ;;  %v1538_v61 = vpop.permute.xlu0 %688 }
  0xa1   : > { %564 = vrot.lane.b32.xlu1 %v1491_v51, %s1356_s12  ;;  %562 = vrot.lane.b32.xlu0 %v1489_v50, %s1356_s12 }
  0xa5   : > { %604 = vrot.lane.b32.xlu1 %v1491_v51, %s1357_s15  ;;  %602 = vrot.lane.b32.xlu0 %v1489_v50, %s1357_s15 }
  0xa9   : > { %633 = vrot.lane.b32.xlu1 %v1489_v50, %s1358_s16  ;;  %635 = vrot.lane.b32.xlu0 %v1491_v51, %s1358_s16 }
  0xad   : > { %666 = vrot.lane.b32.xlu1 %v1491_v51, %s1359_s17  ;;  %664 = vrot.lane.b32.xlu0 %v1489_v50, %s1359_s17 }
  0xb1   : > { %697 = vrot.lane.b32.xlu1 %v1491_v51, %s1360_s18  ;;  %695 = vrot.lane.b32.xlu0 %v1489_v50, %s1360_s18 }
  0xb5   : > { %728 = vperm.xlu0 %1338, %v469_v52  }
 0x107   : > { %v473_v62 = vpop.permute.xlu1 %472  ;;  %v471_v63 = vpop.permute.xlu0 %470 }
 0x108   : > { %v477_v21 = vsel %vm476_vm1, %v471_v63, %v473_v62  ;;  %v478_v22 = vsel %vm476_vm1, %v473_v62, %v471_v63 }
 0x109   : > { %v491_v33 = vmul.f32 %v484_v12, %v478_v22  ;;  %v492_v34 = vmul.f32 %v488_v16, %v477_v21  ;;  %v598_v21 = vmul.f32 %v1528_v56, %v1489_v50  ;;  %v599_v22 = vmul.f32 %v1528_v56, %v1491_v51 }
 0x10b   : > { %v503_v0 = vpop.permute.xlu1 %502  ;;  %v501_v1 = vpop.permute.xlu0 %500  ;;  %v498_v43 = vmul.f32 %v496_v53, %v491_v33  ;;  %v499_v44 = vmul.f32 %v496_v53, %v492_v34  ;;  %v1300_v53 = vld [vmem:[%s1848_s1 + $0x5] ss:$8 sm:$0x3] }
 0x10c   : > { %v505_v13 = vsel %vm504_vm0, %v501_v1, %v503_v0  ;;  %v506_v14 = vsel %vm504_vm0, %v503_v0, %v501_v1  ;;  %v615_v0 = vrot.slane %v1299_v47, %v1477_v17  ;;  %v619_v1 = vrot.slane %v1299_v47, %v1479_v18 }
 0x10d   : > { %v520_v27 = vmul.f32 %v513_v10, %v506_v14  ;;  %v521_v28 = vmul.f32 %v517_v11, %v505_v13  ;;  %v646_v6 = vrot.slane %v1300_v53, %v1477_v17  ;;  %v650_v7 = vrot.slane %v1300_v53, %v1479_v18  ;;  %v1302_v13 = vld [vmem:[%s1848_s1 + $0x7] ss:$8 sm:$0x3] }
 0x10e   : > { %v942_v53 = vld [vmem:[%s1854_s7] sm:$0xff] }
 0x10f   : > { %v532_v2 = vpop.permute.xlu1 %531  ;;  %v534_v3 = vpop.permute.xlu0 %533  ;;  %v527_v39 = vmul.f32 %v525_v55, %v520_v27  ;;  %v528_v40 = vmul.f32 %v525_v55, %v521_v28  ;;  %v708_v27 = vrot.slane %v1302_v13, %v1477_v17  ;;  %v712_v28 = vrot.slane %v1302_v13, %v1479_v18  ;;  %v1309_v13 = vld [vmem:[%s1853_s6 + $0x38] sm:$0xff] }
 0x110   : > { %v536_v23 = vsel %vm535_vm2, %v532_v2, %v534_v3  ;;  %v537_v24 = vsel %vm535_vm2, %v534_v3, %v532_v2 }
 0x111   : > { %v551_v35 = vmul.f32 %v544_v19, %v537_v24  ;;  %v552_v36 = vmul.f32 %v548_v20, %v536_v23  ;;  %v529_v52 = vadd.f32 %v527_v39, %v498_v43  ;;  %v530_v62 = vadd.f32 %v528_v40, %v499_v44 }
 0x113   : > { %v565_v8 = vpop.permute.xlu1 %564  ;;  %v563_v9 = vpop.permute.xlu0 %562  ;;  %v558_v45 = vmul.f32 %v556_v54, %v551_v35  ;;  %v559_v46 = vmul.f32 %v556_v54, %v552_v36  ;;  %v1301_v54 = vld [vmem:[%s1848_s1 + $0x6] ss:$8 sm:$0x3] }
 0x114   : > { %v567_v31 = vsel %vm566_vm3, %v563_v9, %v565_v8  ;;  %v568_v32 = vsel %vm566_vm3, %v565_v8, %v563_v9  ;;  %v677_v8 = vrot.slane %v1301_v54, %v1477_v17  ;;  %v681_v16 = vrot.slane %v1301_v54, %v1479_v18  ;;  %v951_v54 = vld [vmem:[%s1855_s8 + $0x8] sm:$0xff] }
 0x115   : > { %v582_v41 = vmul.f32 %v575_v29, %v568_v32  ;;  %v583_v42 = vmul.f32 %v579_v30, %v567_v31  ;;  %v560_v2 = vadd.f32 %v558_v45, %v529_v52  ;;  %v561_v3 = vadd.f32 %v559_v46, %v530_v62 }
 0x117   : > { %v605_v25 = vpop.permute.xlu1 %604  ;;  %v603_v26 = vpop.permute.xlu0 %602  ;;  %v589_v63 = vmul.f32 %v1530_v57, %v582_v41  ;;  %v590_v55 = vmul.f32 %v1530_v57, %v583_v42 }
 0x118   : > { %v607_v5 = vsel %vm606_vm4, %v603_v26, %v605_v25  ;;  %v608_v57 = vsel %vm606_vm4, %v605_v25, %v603_v26 }
 0x119   : > { %v591_v9 = vadd.f32 %v589_v63, %v560_v2  ;;  %v592_v10 = vadd.f32 %v590_v55, %v561_v3  ;;  %v622_v14 = vmul.f32 %v615_v0, %v607_v5  ;;  %v623_v15 = vmul.f32 %v619_v1, %v608_v57  ;;  %v1303_v63 = vld [vmem:[%s1853_s6 + $0x8] sm:$0xff]  ;;  %v1308_v55 = vld [vmem:[%s1853_s6 + $0x30] sm:$0xff]  ;;  %v953_v0 = vld [vmem:[%s1855_s8 + $0x18] sm:$0xff] }
 0x11a   : > { %v955_v1 = vld [vmem:[%s1855_s8 + $0x28] sm:$0xff]  ;;  %v957_v2 = vld [vmem:[%s1855_s8 + $0x38] sm:$0xff] }
 0x11b   : > { %v634_v37 = vpop.permute.xlu1 %633  ;;  %v636_v38 = vpop.permute.xlu0 %635  ;;  %v601_v29 = vadd.f32 %v599_v22, %v592_v10  ;;  %v600_v30 = vadd.f32 %v598_v21, %v591_v9  ;;  %v629_v56 = vmul.f32 %v1534_v59, %v622_v14  ;;  %v630_v31 = vmul.f32 %v1534_v59, %v623_v15  ;;  %v755_v10 = vld [vmem:[%s1853_s6] sm:$0xff]  ;;  %v952_v15 = vld [vmem:[%s1855_s8 + $0x10] sm:$0xff] }
 0x11c   : > { %v638_v11 = vsel %vm637_vm5, %v634_v37, %v636_v38  ;;  %v639_v12 = vsel %vm637_vm5, %v636_v38, %v634_v37  ;;  %v950_v14 = vld [vmem:[%s1855_s8] sm:$0xff] }
 0x11d   : > { %v653_v25 = vmul.f32 %v646_v6, %v638_v11  ;;  %v654_v26 = vmul.f32 %v650_v7, %v639_v12  ;;  %v631_v38 = vadd.f32 %v629_v56, %v600_v30  ;;  %v632_v39 = vadd.f32 %v630_v31, %v601_v29  ;;  %v1305_v11 = vld [vmem:[%s1853_s6 + $0x18] sm:$0xff]  ;;  %v1307_v12 = vld [vmem:[%s1853_s6 + $0x28] sm:$0xff] }
 0x11f   : > { %v667_v48 = vpop.permute.xlu1 %666  ;;  %v665_v49 = vpop.permute.xlu0 %664  ;;  %v660_v34 = vmul.f32 %v1532_v58, %v653_v25  ;;  %v661_v35 = vmul.f32 %v1532_v58, %v654_v26 }
 0x120   : > { %v669_v23 = vsel %vm668_vm6, %v665_v49, %v667_v48  ;;  %v670_v24 = vsel %vm668_vm6, %v667_v48, %v665_v49 }
 0x121   : > { %v684_v32 = vmul.f32 %v677_v8, %v669_v23  ;;  %v685_v33 = vmul.f32 %v681_v16, %v670_v24  ;;  %v662_v42 = vadd.f32 %v660_v34, %v631_v38  ;;  %v663_v43 = vadd.f32 %v661_v35, %v632_v39  ;;  %v954_v16 = vld [vmem:[%s1855_s8 + $0x20] sm:$0xff] }
 0x123   : > { %v698_v19 = vpop.permute.xlu1 %697  ;;  %v696_v20 = vpop.permute.xlu0 %695  ;;  %v691_v40 = vmul.f32 %v1538_v61, %v684_v32  ;;  %v692_v41 = vmul.f32 %v1538_v61, %v685_v33  ;;  %v1304_v61 = vld [vmem:[%s1853_s6 + $0x10] sm:$0xff] }
 0x124   : > { %v700_v50 = vsel %vm699_vm7, %v696_v20, %v698_v19  ;;  %v701_v51 = vsel %vm699_vm7, %v698_v19, %v696_v20  ;;  %v956_v19 = vld [vmem:[%s1855_s8 + $0x30] sm:$0xff]  ;;  %v958_v20 = vld [vmem:[%s1855_s8 + $0x40] sm:$0xff] }
 0x125   : > { %v715_v36 = vmul.f32 %v708_v27, %v700_v50  ;;  %v716_v37 = vmul.f32 %v712_v28, %v701_v51  ;;  %v694_v45 = vadd.f32 %v692_v41, %v663_v43  ;;  %v693_v46 = vadd.f32 %v691_v40, %v662_v42 }
 0x127   : > { %v722_v44 = vmul.f32 %v1536_v60, %v715_v36  ;;  %v723_v59 = vmul.f32 %v1536_v60, %v716_v37  ;;  %v1306_v60 = vld [vmem:[%s1853_s6 + $0x20] sm:$0xff] }
 0x129   : > { %v725_v47 = vadd.f32 %v723_v59, %v694_v45  ;;  %v724_v48 = vadd.f32 %v722_v44, %v693_v46 }
 0x134   : > { %v729_v49 = vpop.permute.xlu0 %728 }
 0x135   : > { %v731_v58 = vadd.f32 %v729_v49, %v724_v48  ;;  %v732_v52 = vadd.f32 %v729_v49, %v725_v47 }
 0x137   : > { %v733_v62 = vadd.f32 %v732_v52, %v731_v58 }
 0x139   : > { %734 = vadd.xlane.f32.xlu1 %v733_v62 }
 0x14a   : > { %791 = vperm.xlu1 %1339, %v1303_v63  }
 0x14e   : > { %815 = vperm.xlu1 %1339, %v1304_v61  }
 0x152   : > { %863 = vperm.xlu1 %1339, %v1306_v60  }
 0x156   : > { %911 = vperm.xlu1 %1339, %v1308_v55  }
 0x15a   : > { %945 = vperm.xlu1 %1339, %v942_v53  }
 0x15e   : > { %1009 = vperm.xlu1 %1339, %v951_v54  }
 0x162   : > { %1067 = vperm.xlu1 %1339, %v953_v0  }
 0x166   : > { %1105 = vperm.xlu1 %1339, %v955_v1  }
 0x16a   : > { %1163 = vperm.xlu1 %1339, %v957_v2  }
 0x1c6   : > { %v735_v3 = vpop.xlane.xlu1 %734 }
 0x1c7   : > { %v737_v5 = vmul.f32 0.00390625, %v735_v3 }
 0x1c9   : > { %v738_v57 = vsub.f32 %v731_v58, %v737_v5  ;;  %v739_v6 = vsub.f32 %v732_v52, %v737_v5 }
 0x1ca   : > { %v792_v29 = vpop.permute.xlu1 %791 }
 0x1cb   : > { %v740_v7 = vmul.f32 %v738_v57, %v738_v57  ;;  %v741_v8 = vmul.f32 %v739_v6, %v739_v6 }
 0x1cd   : > { %v742_v9 = vadd.f32 %v741_v8, %v740_v7 }
 0x1ce   : > { %v816_v50 = vpop.permute.xlu1 %815 }
 0x1cf   : > { %743 = vadd.xlane.f32.xlu0 %v742_v9 }
 0x1d2   : > { %v864_v61 = vpop.permute.xlu1 %863 }
 0x1e5   : > { %769 = vperm.xlu0 %1338, %v755_v10  }
 0x1e9   : > { %839 = vperm.xlu0 %1338, %v1305_v11  }
 0x1ed   : > { %887 = vperm.xlu0 %1338, %v1307_v12  }
 0x1f1   : > { %935 = vperm.xlu0 %1338, %v1309_v13  }
 0x1f5   : > { %982 = vperm.xlu0 %1338, %v950_v14  }
 0x1f9   : > { %1038 = vperm.xlu0 %1338, %v952_v15  }
 0x1fd   : > { %1076 = vperm.xlu0 %1338, %v954_v16   ;;  %v912_v16 = vpop.permute.xlu1 %911 }
 0x201   : > { %1134 = vperm.xlu0 %1338, %v956_v19  }
 0x205   : > { %1192 = vperm.xlu0 %1338, %v958_v20  }
 0x25c   : > { %v744_v21 = vpop.xlane.xlu0 %743 }
 0x25d   : > { %v745_v22 = vmul.f32 0.00390625, %v744_v21 }
 0x25f   : > { %v746_v23 = vadd.f32 1e-05, %v745_v22 }
 0x261   : > { %1340 = vrsqrt.f32 %v746_v23 }
 0x264   : > { %v770_v30 = vpop.permute.xlu0 %769 }
 0x268   : > { %v840_v41 = vpop.permute.xlu0 %839 }
 0x26b   : > { %v1341_v24 = vpop.eup %1340 }
 0x26c   : > { %v748_v25 = vmul.f32 %v1341_v24, %v738_v57  ;;  %v749_v26 = vmul.f32 %v1341_v24, %v739_v6  ;;  %v888_v2 = vpop.permute.xlu0 %887 }
 0x26e   : > { %v750_v27 = vmax.f32 %v748_v25, 0.0  ;;  %v751_v28 = vmax.f32 %v749_v26, 0.0 }
 0x270   : > { %752 = vst [vmem:[#allocation2] sm:$0xff] %v750_v27  ;;  %753 = vst [vmem:[#allocation2 + $0x8] sm:$0xff] %v751_v28  ;;  %v936_v23 = vpop.permute.xlu0 %935 }
 0x277   : > { %v754_v51 = vld [vmem:[#allocation2] ss:$8 sm:$0x3]  ;;  %v775_v56 = vld [vmem:[#allocation2 + $0x1] ss:$8 sm:$0x3] }
 0x278   : > { %v760_v31 = vrot.slane %v754_v51, %v1477_v17  ;;  %v764_v32 = vrot.slane %v754_v51, %v1479_v18  ;;  %v782_v33 = vrot.slane %v775_v56, %v1477_v17  ;;  %v786_v34 = vrot.slane %v775_v56, %v1479_v18  ;;  %v799_v35 = vld [vmem:[#allocation2 + $0x2] ss:$8 sm:$0x3]  ;;  %v823_v36 = vld [vmem:[#allocation2 + $0x3] ss:$8 sm:$0x3] }
 0x279   : > { %v806_v37 = vrot.slane %v799_v35, %v1477_v17  ;;  %v810_v38 = vrot.slane %v799_v35, %v1479_v18  ;;  %v830_v39 = vrot.slane %v823_v36, %v1477_v17  ;;  %v834_v40 = vrot.slane %v823_v36, %v1479_v18  ;;  %v847_v42 = vld [vmem:[#allocation2 + $0x4] ss:$8 sm:$0x3]  ;;  %v871_v46 = vld [vmem:[#allocation2 + $0x5] ss:$8 sm:$0x3] }
 0x27a   : > { %v772_v43 = vmul.f32 %v770_v30, %v760_v31  ;;  %v773_v44 = vmul.f32 %v770_v30, %v764_v32  ;;  %v794_v59 = vmul.f32 %v792_v29, %v782_v33  ;;  %v795_v45 = vmul.f32 %v792_v29, %v786_v34  ;;  %v895_v63 = vld [vmem:[#allocation2 + $0x6] ss:$8 sm:$0x3]  ;;  %v919_v57 = vld [vmem:[#allocation2 + $0x7] ss:$8 sm:$0x3]  ;;  %v946_v30 = vpop.permute.xlu1 %945  ;;  %v983_v31 = vpop.permute.xlu0 %982 }
 0x27b   : > { %v818_v47 = vmul.f32 %v816_v50, %v806_v37  ;;  %v819_v48 = vmul.f32 %v816_v50, %v810_v38  ;;  %v854_v52 = vrot.slane %v847_v42, %v1477_v17  ;;  %v858_v62 = vrot.slane %v847_v42, %v1479_v18  ;;  %v959_v56 = vld [vmem:[%s1856_s9] sm:$0xff] }
 0x27c   : > { %v796_v49 = vadd.f32 %v794_v59, %v772_v43  ;;  %v797_v58 = vadd.f32 %v795_v45, %v773_v44  ;;  %v878_v60 = vrot.slane %v871_v46, %v1477_v17  ;;  %v882_v55 = vrot.slane %v871_v46, %v1479_v18  ;;  %v1310_v45 = vld [vmem:[%s1848_s1 + $0x1] ss:$8 sm:$0x3]  ;;  %v966_v46 = vld [vmem:[%s1848_s1] ss:$8 sm:$0x3] }
 0x27d   : > { %v842_v0 = vmul.f32 %v840_v41, %v830_v39  ;;  %v843_v1 = vmul.f32 %v840_v41, %v834_v40  ;;  %v902_v3 = vrot.slane %v895_v63, %v1477_v17  ;;  %v906_v5 = vrot.slane %v895_v63, %v1479_v18 }
 0x27e   : > { %v820_v53 = vadd.f32 %v818_v47, %v796_v49  ;;  %v821_v54 = vadd.f32 %v819_v48, %v797_v58  ;;  %v866_v8 = vmul.f32 %v864_v61, %v854_v52  ;;  %v867_v9 = vmul.f32 %v864_v61, %v858_v62  ;;  %v1010_v32 = vpop.permute.xlu1 %1009  ;;  %v1039_v33 = vpop.permute.xlu0 %1038  ;;  %v1311_v47 = vld [vmem:[%s1848_s1 + $0x2] ss:$8 sm:$0x3]  ;;  %v1312_v61 = vld [vmem:[%s1848_s1 + $0x3] ss:$8 sm:$0x3] }
 0x27f   : > { %v890_v10 = vmul.f32 %v888_v2, %v878_v60  ;;  %v891_v11 = vmul.f32 %v888_v2, %v882_v55  ;;  %v926_v14 = vrot.slane %v919_v57, %v1477_v17  ;;  %v930_v15 = vrot.slane %v919_v57, %v1479_v18 }
 0x280   : > { %v844_v6 = vadd.f32 %v842_v0, %v820_v53  ;;  %v845_v7 = vadd.f32 %v843_v1, %v821_v54  ;;  %v914_v21 = vmul.f32 %v912_v16, %v902_v3  ;;  %v915_v22 = vmul.f32 %v912_v16, %v906_v5 }
 0x281   : > { %v938_v26 = vmul.f32 %v936_v23, %v926_v14  ;;  %v939_v27 = vmul.f32 %v936_v23, %v930_v15  ;;  %v998_v58 = vrot.slane %v1310_v45, %v1477_v17  ;;  %v1002_v52 = vrot.slane %v1310_v45, %v1479_v18 }
 0x282   : > { %v868_v12 = vadd.f32 %v866_v8, %v844_v6  ;;  %v869_v13 = vadd.f32 %v867_v9, %v845_v7  ;;  %v1068_v34 = vpop.permute.xlu1 %1067  ;;  %v1746_v35 = vpop.permute.xlu0 %1076  ;;  %v971_v60 = vrot.slane %v966_v46, %v1477_v17  ;;  %v975_v55 = vrot.slane %v966_v46, %v1479_v18 }
 0x283   : > { %v1027_v53 = vrot.slane %v1311_v47, %v1477_v17  ;;  %v1031_v54 = vrot.slane %v1311_v47, %v1479_v18  ;;  %v1056_v8 = vrot.slane %v1312_v61, %v1477_v17  ;;  %v1060_v9 = vrot.slane %v1312_v61, %v1479_v18 }
 0x284   : > { %v892_v19 = vadd.f32 %v890_v10, %v868_v12  ;;  %v893_v20 = vadd.f32 %v891_v11, %v869_v13 }
 0x286   : > { %v916_v24 = vadd.f32 %v914_v21, %v892_v19  ;;  %v917_v25 = vadd.f32 %v915_v22, %v893_v20  ;;  %v1748_v36 = vpop.permute.xlu1 %1105  ;;  %v1750_v37 = vpop.permute.xlu0 %1134 }
 0x288   : > { %v940_v28 = vadd.f32 %v938_v26, %v916_v24  ;;  %v941_v29 = vadd.f32 %v939_v27, %v917_v25 }
 0x28a   : > { %v1707_v50 = vadd.f32 %v946_v30, %v940_v28  ;;  %v1709_v51 = vadd.f32 %v946_v30, %v941_v29  ;;  %v1752_v38 = vpop.permute.xlu1 %1163  ;;  %v1754_v39 = vpop.permute.xlu0 %1192  ;;  %v1313_v28 = vld [vmem:[%s1848_s1 + $0x4] ss:$8 sm:$0x3] }
 0x28c   : > { %962 = vrot.lane.b32.xlu0 %v1709_v51, %s1353_s29  ;;  %960 = vrot.lane.b32.xlu1 %v1707_v50, %s1353_s29  ;;  %s1320_s29 = sshll.u32 %s1859_s14, 4 }
 0x290   : > { %989 = vrot.lane.b32.xlu0 %v1709_v51, %s1354_s30  ;;  %987 = vrot.lane.b32.xlu1 %v1707_v50, %s1354_s30 }
 0x294   : > { %1016 = vrot.lane.b32.xlu0 %v1707_v50, %s1355_s11  ;;  %1018 = vrot.lane.b32.xlu1 %v1709_v51, %s1355_s11 }
 0x298   : > { %1047 = vrot.lane.b32.xlu0 %v1709_v51, %s1356_s12  ;;  %1045 = vrot.lane.b32.xlu1 %v1707_v50, %s1356_s12  ;;  %s359_s12 = scalar_lea.vmem %s1857_s10, %s1320_s29 }
 0x29c   : > { %1085 = vrot.lane.b32.xlu0 %v1709_v51, %s1357_s15  ;;  %1083 = vrot.lane.b32.xlu1 %v1707_v50, %s1357_s15 }
 0x2a0   : > { %1112 = vrot.lane.b32.xlu0 %v1707_v50, %s1358_s16  ;;  %1114 = vrot.lane.b32.xlu1 %v1709_v51, %s1358_s16 }
 0x2a4   : > { %1143 = vrot.lane.b32.xlu0 %v1709_v51, %s1359_s17  ;;  %1141 = vrot.lane.b32.xlu1 %v1707_v50, %s1359_s17 }
 0x2a8   : > { %1172 = vrot.lane.b32.xlu0 %v1709_v51, %s1360_s18  ;;  %1170 = vrot.lane.b32.xlu1 %v1707_v50, %s1360_s18 }
 0x2ac   : > { %1201 = vperm.xlu1 %1339, %v959_v56  }
 0x2fe   : > { %v963_v40 = vpop.permute.xlu0 %962  ;;  %v961_v41 = vpop.permute.xlu1 %960 }
 0x2ff   : > { %v964_v0 = vsel %vm476_vm1, %v961_v41, %v963_v40  ;;  %v965_v1 = vsel %vm476_vm1, %v963_v40, %v961_v41 }
 0x300   : > { %v978_v12 = vmul.f32 %v971_v60, %v965_v1  ;;  %v979_v13 = vmul.f32 %v975_v55, %v964_v0  ;;  %v1079_v0 = vmul.f32 %v1746_v35, %v1707_v50  ;;  %v1080_v1 = vmul.f32 %v1746_v35, %v1709_v51 }
 0x302   : > { %v990_v42 = vpop.permute.xlu0 %989  ;;  %v988_v43 = vpop.permute.xlu1 %987  ;;  %v985_v24 = vmul.f32 %v983_v31, %v978_v12  ;;  %v986_v25 = vmul.f32 %v983_v31, %v979_v13  ;;  %v1098_v31 = vrot.slane %v1313_v28, %v1479_v18 }
 0x303   : > { %v991_v62 = vsel %vm504_vm0, %v988_v43, %v990_v42  ;;  %v992_v63 = vsel %vm504_vm0, %v990_v42, %v988_v43  ;;  %v1094_v43 = vrot.slane %v1313_v28, %v1477_v17 }
 0x304   : > { %v1005_v6 = vmul.f32 %v998_v58, %v992_v63  ;;  %v1006_v7 = vmul.f32 %v1002_v52, %v991_v62  ;;  %v1316_v62 = vld [vmem:[%s1848_s1 + $0x7] ss:$8 sm:$0x3] }
 0x306   : > { %v1017_v44 = vpop.permute.xlu0 %1016  ;;  %v1019_v59 = vpop.permute.xlu1 %1018  ;;  %v1012_v20 = vmul.f32 %v1010_v32, %v1005_v6  ;;  %v1013_v21 = vmul.f32 %v1010_v32, %v1006_v7  ;;  %v1314_v32 = vld [vmem:[%s1848_s1 + $0x5] ss:$8 sm:$0x3]  ;;  %v1181_v6 = vrot.slane %v1316_v62, %v1477_v17  ;;  %v1185_v7 = vrot.slane %v1316_v62, %v1479_v18 }
 0x307   : > { %v1020_v2 = vsel %vm535_vm2, %v1017_v44, %v1019_v59  ;;  %v1021_v3 = vsel %vm535_vm2, %v1019_v59, %v1017_v44  ;;  %v1123_v46 = vrot.slane %v1314_v32, %v1477_v17  ;;  %v1127_v47 = vrot.slane %v1314_v32, %v1479_v18 }
 0x308   : > { %v1034_v14 = vmul.f32 %v1027_v53, %v1021_v3  ;;  %v1035_v15 = vmul.f32 %v1031_v54, %v1020_v2  ;;  %v1014_v56 = vadd.f32 %v1012_v20, %v985_v24  ;;  %v1015_v40 = vadd.f32 %v1013_v21, %v986_v25 }
 0x30a   : > { %v1048_v48 = vpop.permute.xlu0 %1047  ;;  %v1046_v49 = vpop.permute.xlu1 %1045  ;;  %v1041_v26 = vmul.f32 %v1039_v33, %v1034_v14  ;;  %v1042_v27 = vmul.f32 %v1039_v33, %v1035_v15 }
 0x30b   : > { %v1049_v10 = vsel %vm566_vm3, %v1046_v49, %v1048_v48  ;;  %v1050_v11 = vsel %vm566_vm3, %v1048_v48, %v1046_v49 }
 0x30c   : > { %v1063_v22 = vmul.f32 %v1056_v8, %v1050_v11  ;;  %v1064_v23 = vmul.f32 %v1060_v9, %v1049_v10  ;;  %v1043_v44 = vadd.f32 %v1041_v26, %v1014_v56  ;;  %v1044_v33 = vadd.f32 %v1042_v27, %v1015_v40 }
 0x30e   : > { %v1086_v5 = vpop.permute.xlu0 %1085  ;;  %v1084_v57 = vpop.permute.xlu1 %1083  ;;  %v1070_v41 = vmul.f32 %v1068_v34, %v1063_v22  ;;  %v1071_v42 = vmul.f32 %v1068_v34, %v1064_v23  ;;  %v1315_v34 = vld [vmem:[%s1848_s1 + $0x6] ss:$8 sm:$0x3] }
 0x30f   : > { %v1087_v59 = vsel %vm606_vm4, %v1084_v57, %v1086_v5  ;;  %v1088_v45 = vsel %vm606_vm4, %v1086_v5, %v1084_v57  ;;  %v1152_v60 = vrot.slane %v1315_v34, %v1477_v17  ;;  %v1156_v55 = vrot.slane %v1315_v34, %v1479_v18 }
 0x310   : > { %v1072_v48 = vadd.f32 %v1070_v41, %v1043_v44  ;;  %v1073_v49 = vadd.f32 %v1071_v42, %v1044_v33  ;;  %v1101_v63 = vmul.f32 %v1094_v43, %v1087_v59  ;;  %v1102_v61 = vmul.f32 %v1098_v31, %v1088_v45 }
 0x312   : > { %v1113_v16 = vpop.permute.xlu0 %1112  ;;  %v1115_v19 = vpop.permute.xlu1 %1114  ;;  %v1081_v8 = vadd.f32 %v1079_v0, %v1072_v48  ;;  %v1082_v9 = vadd.f32 %v1080_v1, %v1073_v49  ;;  %v1108_v35 = vmul.f32 %v1748_v36, %v1101_v63  ;;  %v1109_v10 = vmul.f32 %v1748_v36, %v1102_v61 }
 0x313   : > { %v1116_v58 = vsel %vm637_vm5, %v1113_v16, %v1115_v19  ;;  %v1117_v52 = vsel %vm637_vm5, %v1115_v19, %v1113_v16 }
 0x314   : > { %v1130_v5 = vmul.f32 %v1123_v46, %v1116_v58  ;;  %v1131_v57 = vmul.f32 %v1127_v47, %v1117_v52  ;;  %v1110_v15 = vadd.f32 %v1108_v35, %v1081_v8  ;;  %v1111_v16 = vadd.f32 %v1109_v10, %v1082_v9 }
 0x316   : > { %v1144_v29 = vpop.permute.xlu0 %1143  ;;  %v1142_v30 = vpop.permute.xlu1 %1141  ;;  %v1137_v13 = vmul.f32 %v1750_v37, %v1130_v5  ;;  %v1138_v17 = vmul.f32 %v1750_v37, %v1131_v57 }
 0x317   : > { %v1145_v2 = vsel %vm668_vm6, %v1142_v30, %v1144_v29  ;;  %v1146_v3 = vsel %vm668_vm6, %v1144_v29, %v1142_v30 }
 0x318   : > { %v1159_v11 = vmul.f32 %v1152_v60, %v1145_v2  ;;  %v1160_v12 = vmul.f32 %v1156_v55, %v1146_v3  ;;  %v1139_v4 = vadd.f32 %v1137_v13, %v1110_v15  ;;  %v1140_v21 = vadd.f32 %v1138_v17, %v1111_v16 }
 0x31a   : > { %v1173_v53 = vpop.permute.xlu0 %1172  ;;  %v1171_v54 = vpop.permute.xlu1 %1170  ;;  %v1166_v19 = vmul.f32 %v1752_v38, %v1159_v11  ;;  %v1167_v20 = vmul.f32 %v1752_v38, %v1160_v12 }
 0x31b   : > { %v1174_v50 = vsel %vm699_vm7, %v1171_v54, %v1173_v53  ;;  %v1175_v51 = vsel %vm699_vm7, %v1173_v53, %v1171_v54 }
 0x31c   : > { %v1188_v14 = vmul.f32 %v1181_v6, %v1174_v50  ;;  %v1189_v18 = vmul.f32 %v1185_v7, %v1175_v51  ;;  %v1168_v23 = vadd.f32 %v1166_v19, %v1139_v4  ;;  %v1169_v24 = vadd.f32 %v1167_v20, %v1140_v21 }
 0x31e   : > { %v1195_v22 = vmul.f32 %v1754_v39, %v1188_v14  ;;  %v1196_v36 = vmul.f32 %v1754_v39, %v1189_v18 }
 0x320   : > { %v1197_v25 = vadd.f32 %v1195_v22, %v1168_v23  ;;  %v1198_v26 = vadd.f32 %v1196_v36, %v1169_v24 }
 0x32b   : > { %v1202_v27 = vpop.permute.xlu1 %1201 }
 0x32c   : > { %v1204_v37 = vadd.f32 %v1202_v27, %v1197_v25  ;;  %v1205_v28 = vadd.f32 %v1202_v27, %v1198_v26 }
 0x32e   : > { %v1206_v29 = vadd.f32 %v1205_v28, %v1204_v37 }
 0x330   : > { %1207 = vadd.xlane.f32.xlu0 %v1206_v29 }
 0x3bd   : > { %v1208_v30 = vpop.xlane.xlu0 %1207 }
 0x3be   : > { %v1209_v56 = vmul.f32 0.00390625, %v1208_v30 }
 0x3c0   : > { %v1210_v40 = vsub.f32 %v1204_v37, %v1209_v56  ;;  %v1211_v38 = vsub.f32 %v1205_v28, %v1209_v56 }
 0x3c2   : > { %v1212_v41 = vmul.f32 %v1210_v40, %v1210_v40  ;;  %v1213_v42 = vmul.f32 %v1211_v38, %v1211_v38 }
 0x3c4   : > { %v1214_v32 = vadd.f32 %v1213_v42, %v1212_v41 }
 0x3c6   : > { %1215 = vadd.xlane.f32.xlu1 %v1214_v32 }
 0x453   : > { %v1216_v43 = vpop.xlane.xlu1 %1215 }
 0x454   : > { %v1217_v39 = vmul.f32 0.00390625, %v1216_v43 }
 0x456   : > { %v1218_v31 = vadd.f32 1e-05, %v1217_v39 }
 0x458   : > { %1342 = vrsqrt.f32 %v1218_v31 }
 0x462   : > { %v1343_v44 = vpop.eup %1342 }
 0x463   : > { %v1220_v33 = vmul.f32 %v1343_v44, %v1210_v40  ;;  %v1221_v59 = vmul.f32 %v1343_v44, %v1211_v38 }
 0x465   : > { %v1222_v45 = vmax.f32 %v1220_v33, 0.0  ;;  %v1223_v34 = vmax.f32 %v1221_v59, 0.0 }
 0x467   : > { %1224 = vst [vmem:[%s359_s12] sm:$0xff] %v1222_v45  ;;  %1225 = vst [vmem:[%s359_s12 + $0x8] sm:$0xff] %v1223_v34 }
 0x468 PF: > { %s20_s13 = sadd.s32 1, %s1350_s13  }
 0x469   : > { %p17_p4 = scmp.ge.s32.totalorder %s20_s13, 4  }
 0x46b   :  { %19 = sbr.rel (!%p17_p4) target bundleno = 1 (0x1), region = 117 }

</bundles_post_ra>
